<compile_context>
chip_gen: v6e
topology: v6e:2x2x1
jax: 0.10.0
libtpu: 0.0.40
codegen_flags: <defaults>
</compile_context>

<pallas_src>
import numpy as np

import jax
import jax.numpy as jnp
from jax.experimental import pallas as pl
from jax.experimental.pallas import tpu as pltpu

_EPS = 1e-8        # same eps as F.cosine_similarity default
_LANE = 128
_SUB = 8


def _cdiv(a, b):
    return -(-a // b)


def _make_in_index_map(start_blk, n_blk, steps_per_core):
    """Index map for one pair's (B, M_p, 128) operand.

    The block index is clamped to the pair's own block range, so outside the
    pair's steps it stays constant and the pipeline elides the re-fetch.
    """
    def index_map(c, k, *_prefetch):
        g = c * steps_per_core + k
        return (0, jnp.clip(g - start_blk, 0, n_blk - 1), 0)
    return index_map


def _make_out_index_map(steps_per_core):
    def index_map(c, k, pair_id_ref, *_prefetch):
        return (c, pair_id_ref[c * steps_per_core + k], 0, 0, 0)
    return index_map


def _make_kernel(pair_chunks, batch, steps_per_core):
    n_pairs = len(pair_chunks)

    def kernel(pair_id_ref, first_ref, vrows_ref, *refs):
        lows = refs[:n_pairs]
        highs = refs[n_pairs:2 * n_pairs]
        dot_out, l2_out, h2_out = refs[2 * n_pairs:2 * n_pairs + 3]

        c = pl.program_id(0)
        k = pl.program_id(1)
        g = c * steps_per_core + k
        pid = pair_id_ref[g]
        vrows = vrows_ref[g]

        # First block of a (core, pair) run: the resident output block is
        # write-only (never fetched from HBM), so initialize it here.
        @pl.when(first_ref[g] == 1)
        def _init():
            dot_out[...] = jnp.zeros_like(dot_out)
            l2_out[...] = jnp.zeros_like(l2_out)
            h2_out[...] = jnp.zeros_like(h2_out)

        # Unrolled per-pair dispatch: only the active pair's branch executes.
        for p in range(n_pairs):
            chunk = pair_chunks[p]

            @pl.when(pid == p)
            def _accumulate(p=p, chunk=chunk):
                l = lows[p][...].astype(jnp.float32)
                h = highs[p][...].astype(jnp.float32)
                # Mask the ragged tail of the pair's last block (rows past
                # the real extent hold garbage from the clamped DMA).
                rows = jax.lax.broadcasted_iota(
                    jnp.int32, (batch, chunk, _LANE), 1)
                keep = rows < vrows
                l = jnp.where(keep, l, 0.0)
                h = jnp.where(keep, h, 0.0)
                p_lh = l * h
                p_ll = l * l
                p_hh = h * h
                if chunk % _SUB == 0:
                    # Reduce the chunk axis with pure VALU adds (no XLU) to a
                    # single (B, 8, 128) partial per quantity, then accumulate
                    # into the resident lane-dense output block.
                    groups = chunk // _SUB
                    dot_out[...] += p_lh.reshape(
                        batch, groups, _SUB, _LANE).sum(axis=1)
                    l2_out[...] += p_ll.reshape(
                        batch, groups, _SUB, _LANE).sum(axis=1)
                    h2_out[...] += p_hh.reshape(
                        batch, groups, _SUB, _LANE).sum(axis=1)
                else:
                    # Tiny pair (< 8 rows, single block): accumulate into the
                    # leading sublane rows of the output block.
                    dot_out[:, 0:chunk, :] += p_lh
                    l2_out[:, 0:chunk, :] += p_ll
                    h2_out[:, 0:chunk, :] += p_hh

    return kernel


@jax.jit
def _distill_forward(low_feats, high_feats, param):
    """sum_p mean_b(1 - cos_sim(low_p, high_p)) * param, one pallas_call."""
    n_pairs = len(low_feats)
    if n_pairs == 0 or n_pairs != len(high_feats):
        raise ValueError("low_feature / high_feature must be equal-length, non-empty")
    batch = low_feats[0].shape[0]

    lows, highs, rows_per_pair = [], [], []
    for l, h in zip(low_feats, high_feats):
        if l.shape[0] != batch or h.shape[0] != batch:
            raise ValueError("all feature maps must share the batch dimension")
        d_l = int(np.prod(l.shape[1:], dtype=np.int64)) if l.ndim > 1 else 1
        d_h = int(np.prod(h.shape[1:], dtype=np.int64)) if h.ndim > 1 else 1
        if d_l != d_h:
            raise ValueError(
                f"low/high pair has mismatched flattened sizes ({d_l} vs {d_h})")
        lf = l.reshape(batch, d_l)
        hf = h.reshape(batch, d_h)
        pad = (-d_l) % _LANE
        if pad:
            # TODO(synk): avoid this copy for D % 128 != 0 by also masking the
            # lane tail in-kernel; typical conv features are 128-aligned.
            lf = jnp.pad(lf, ((0, 0), (0, pad)))
            hf = jnp.pad(hf, ((0, 0), (0, pad)))
        m = (d_l + pad) // _LANE
        lows.append(lf.reshape(batch, m, _LANE))
        highs.append(hf.reshape(batch, m, _LANE))
        rows_per_pair.append(m)

    # ---- per-pair tile sizing: lane-dense (B, chunk, 128) blocks ----
    tile_budget = min(2 << 20, max(256 << 10, (12 << 20) // (4 * n_pairs)))
    chunks, n_blks, start_blks = [], [], []
    pair_of_block, vrows_of_block = [], []
    start = 0
    for p, m in enumerate(rows_per_pair):
        isz = max(jnp.dtype(low_feats[p].dtype).itemsize,
                  jnp.dtype(high_feats[p].dtype).itemsize)
        budget_rows = max(_SUB, (tile_budget // (batch * _LANE * isz)) // _SUB * _SUB)
        if m >= _SUB:
            chunk = min(budget_rows, (m // _SUB) * _SUB)   # multiple of 8 rows
        else:
            chunk = m                                      # tiny pair: one block
        n_blk = _cdiv(m, chunk)
        chunks.append(chunk)
        n_blks.append(n_blk)
        start_blks.append(start)
        for i in range(n_blk):
            pair_of_block.append(p)
            vrows_of_block.append(min(chunk, m - i * chunk))
        start += n_blk
    n_blocks = start

    # ---- schedule: split the flat block stream across (up to) two cores ----
    n_cores = 2 if n_blocks >= 2 else 1       # 2 TCs on v7x; serial (harmless) on v5e/v6e
    steps = _cdiv(n_blocks, n_cores)
    n_steps_total = n_cores * steps

    pair_id_tbl = np.zeros((n_steps_total,), np.int32)
    first_tbl = np.zeros((n_steps_total,), np.int32)
    vrows_tbl = np.zeros((n_steps_total,), np.int32)
    cover = np.zeros((n_cores, n_pairs), bool)
    for c in range(n_cores):
        for k in range(steps):
            g = c * steps + k
            if g < n_blocks:
                pair_id_tbl[g] = pair_of_block[g]
                vrows_tbl[g] = vrows_of_block[g]
                first_tbl[g] = 1 if (k == 0 or pair_of_block[g] != pair_of_block[g - 1]) else 0
                cover[c, pair_of_block[g]] = True
            else:
                # Padding step: re-visit the last pair with zero valid rows.
                pair_id_tbl[g] = pair_of_block[n_blocks - 1]
                vrows_tbl[g] = 0
                first_tbl[g] = 0

    # ---- specs ----
    in_specs = []
    for p in range(n_pairs):                  # low_0 .. low_{P-1}
        in_specs.append(pl.BlockSpec(
            (batch, chunks[p], _LANE),
            _make_in_index_map(start_blks[p], n_blks[p], steps)))
    for p in range(n_pairs):                  # high_0 .. high_{P-1}
        in_specs.append(pl.BlockSpec(
            (batch, chunks[p], _LANE),
            _make_in_index_map(start_blks[p], n_blks[p], steps)))

    out_imap = _make_out_index_map(steps)
    out_block = (None, None, batch, _SUB, _LANE)   # (core, pair) dims squeezed
    out_specs = (pl.BlockSpec(out_block, out_imap),
                 pl.BlockSpec(out_block, out_imap),
                 pl.BlockSpec(out_block, out_imap))
    out_shape = tuple(
        jax.ShapeDtypeStruct((n_cores, n_pairs, batch, _SUB, _LANE), jnp.float32)
        for _ in range(3))

    # ---- cost / VMEM bookkeeping ----
    total_elems = sum(batch * int(np.prod(l.shape[1:], dtype=np.int64))
                      for l in low_feats)
    bytes_accessed = sum(
        batch * int(np.prod(l.shape[1:], dtype=np.int64))
        * (jnp.dtype(l.dtype).itemsize + jnp.dtype(h.dtype).itemsize)
        for l, h in zip(low_feats, high_feats))
    bytes_accessed += 3 * n_cores * n_pairs * batch * _SUB * _LANE * 4

    vmem_need = 3 * 2 * batch * _SUB * _LANE * 4         # double-buffered outputs
    for p in range(n_pairs):                              # double-buffered inputs
        isz = (jnp.dtype(low_feats[p].dtype).itemsize
               + jnp.dtype(high_feats[p].dtype).itemsize)
        vmem_need += 2 * batch * chunks[p] * _LANE * isz
    vmem_limit = int(max(12 << 20, vmem_need + (4 << 20)))

    kernel = _make_kernel(tuple(chunks), batch, steps)

    dot_raw, l2_raw, h2_raw = pl.pallas_call(
        kernel,
        out_shape=out_shape,
        grid_spec=pltpu.PrefetchScalarGridSpec(
            num_scalar_prefetch=3,
            grid=(n_cores, steps),
            in_specs=in_specs,
            out_specs=out_specs,
        ),
        compiler_params=pltpu.CompilerParams(
            dimension_semantics=("parallel", "arbitrary"),
            vmem_limit_bytes=vmem_limit,
        ),
        cost_estimate=pl.CostEstimate(
            flops=int(6 * total_elems),
            transcendentals=0,
            bytes_accessed=int(bytes_accessed),
        ),
    )(jnp.asarray(pair_id_tbl), jnp.asarray(first_tbl), jnp.asarray(vrows_tbl),
      *lows, *highs)

    # ---- finalize in plain JAX (kernel epilogue is XLU-free) ----
    keep = jnp.asarray(cover)[:, :, None, None, None]     # mask never-written slices
    dot = jnp.sum(jnp.where(keep, dot_raw, 0.0), axis=(0, 3, 4))   # (P, B)
    l2 = jnp.sum(jnp.where(keep, l2_raw, 0.0), axis=(0, 3, 4))
    h2 = jnp.sum(jnp.where(keep, h2_raw, 0.0), axis=(0, 3, 4))
    norm = jnp.maximum(jnp.sqrt(l2), _EPS) * jnp.maximum(jnp.sqrt(h2), _EPS)
    cos = dot / norm
    per_pair = jnp.mean(1.0 - cos, axis=1)                          # (P,)
    return jnp.sum(per_pair) * param


class DistillLoss:
    """JAX/Pallas port of utility/distill_loss.DistillLoss (forward only)."""

    def __init__(self, args, device=None):
        self.device = device
        self.args = args
        self.criterion = self.cosine_loss

    @property
    def _param(self):
        if hasattr(self.args, "distill_attn_param"):
            return float(self.args.distill_attn_param)
        return float(self.args)

    def cosine_loss(self, l, h):
        # torch's cosine_loss: mean(1 - cos_sim), no param scaling.
        return _distill_forward((l,), (h,), jnp.float32(1.0))

    def forward(self, low_feature, high_feature):
        return _distill_forward(tuple(low_feature), tuple(high_feature),
                                jnp.float32(self._param))

    __call__ = forward


def _reference_loss(low_feature, high_feature, param):
    """Pure-jnp reference of the torch forward (sanity check)."""
    total = jnp.float32(0.0)
    for l, h in zip(low_feature, high_feature):
        b = l.shape[0]
        lf = l.reshape(b, -1).astype(jnp.float32)
        hf = h.reshape(b, -1).astype(jnp.float32)
        dot = jnp.sum(lf * hf, axis=1)
        nl = jnp.maximum(jnp.linalg.norm(lf, axis=1), _EPS)
        nh = jnp.maximum(jnp.linalg.norm(hf, axis=1), _EPS)
        cos = dot / (nl * nh)
        total = total + jnp.mean(1.0 - cos) * param
    return total


if __name__ == "__main__":
    import types

    key = jax.random.PRNGKey(0)
    ks = jax.random.split(key, 8)

    # Four feature pairs (NCHW, as the torch module would receive), exercising:
    # aligned single block, tiny (<8 row) blocks, a 128-unaligned pair, and a
    # multi-block pair with a ragged (masked) last block.
    low_feature = [
        jax.random.normal(ks[0], (2, 4, 16, 16), dtype=jnp.float32),
        jax.random.normal(ks[1], (2, 8, 8, 8), dtype=jnp.float32),
        jax.random.normal(ks[2], (2, 3, 10, 10), dtype=jnp.float32),
        jax.random.normal(ks[3], (2, 4, 40, 16), dtype=jnp.float32),
    ]
    high_feature = [
        jax.random.normal(ks[4], (2, 4, 16, 16), dtype=jnp.float32),
        jax.random.normal(ks[5], (2, 8, 8, 8), dtype=jnp.float32),
        jax.random.normal(ks[6], (2, 3, 10, 10), dtype=jnp.float32),
        jax.random.normal(ks[7], (2, 4, 40, 16), dtype=jnp.float32),
    ]

    args = types.SimpleNamespace(distill_attn_param=0.5)
    loss_mod = DistillLoss(args, device=None)

    loss = jax.block_until_ready(loss_mod(low_feature, high_feature))
    ref = jax.block_until_ready(
        _reference_loss(low_feature, high_feature, args.distill_attn_param))
    assert abs(float(loss) - float(ref)) < 1e-3, (float(loss), float(ref))

    print("KERNEL_OK")
</pallas_src>

<mosaic_0001>
module attributes {stable_mosaic.version = 11 : i64} {
  func.func @kernel(%arg0: i32, %arg1: i32, %arg2: memref<6xi32, #tpu.memory_space<smem>>, %arg3: memref<6xi32, #tpu.memory_space<smem>>, %arg4: memref<6xi32, #tpu.memory_space<smem>>, %arg5: memref<2x8x128xf32, #tpu.memory_space<vmem>>, %arg6: memref<2x4x128xf32, #tpu.memory_space<vmem>>, %arg7: memref<2x3x128xf32, #tpu.memory_space<vmem>>, %arg8: memref<2x16x128xf32, #tpu.memory_space<vmem>>, %arg9: memref<2x8x128xf32, #tpu.memory_space<vmem>>, %arg10: memref<2x4x128xf32, #tpu.memory_space<vmem>>, %arg11: memref<2x3x128xf32, #tpu.memory_space<vmem>>, %arg12: memref<2x16x128xf32, #tpu.memory_space<vmem>>, %arg13: memref<1x1x2x8x128xf32, #tpu.memory_space<vmem>>, %arg14: memref<1x1x2x8x128xf32, #tpu.memory_space<vmem>>, %arg15: memref<1x1x2x8x128xf32, #tpu.memory_space<vmem>>) attributes {dimension_semantics = [#tpu.dimension_semantics<parallel>, #tpu.dimension_semantics<arbitrary>], iteration_bounds = array<i64: 2, 3>, scalar_prefetch = 3 : i64, scratch_operands = 0 : i64, tpu.core_type = #tpu.core_type<tc>, window_params = [{transform_indices = @transform_0, window_bounds = array<i64: 2, 8, 128>}, {transform_indices = @transform_1, window_bounds = array<i64: 2, 4, 128>}, {transform_indices = @transform_2, window_bounds = array<i64: 2, 3, 128>}, {transform_indices = @transform_3, window_bounds = array<i64: 2, 16, 128>}, {transform_indices = @transform_4, window_bounds = array<i64: 2, 8, 128>}, {transform_indices = @transform_5, window_bounds = array<i64: 2, 4, 128>}, {transform_indices = @transform_6, window_bounds = array<i64: 2, 3, 128>}, {transform_indices = @transform_7, window_bounds = array<i64: 2, 16, 128>}, {transform_indices = @transform_8, window_bounds = array<i64: 1, 1, 2, 8, 128>}, {transform_indices = @transform_9, window_bounds = array<i64: 1, 1, 2, 8, 128>}, {transform_indices = @transform_10, window_bounds = array<i64: 1, 1, 2, 8, 128>}]} {
    %c3_i32 = arith.constant 3 : i32
    %0 = arith.muli %arg0, %c3_i32 : i32
    %1 = arith.addi %0, %arg1 : i32
    %2 = arith.index_cast %1 : i32 to index
    %3 = memref.load %arg2[%2] : memref<6xi32, #tpu.memory_space<smem>>
    %4 = arith.index_cast %1 : i32 to index
    %5 = memref.load %arg4[%4] : memref<6xi32, #tpu.memory_space<smem>>
    %6 = arith.index_cast %1 : i32 to index
    %7 = memref.load %arg3[%6] : memref<6xi32, #tpu.memory_space<smem>>
    %c1_i32 = arith.constant 1 : i32
    %8 = arith.cmpi eq, %7, %c1_i32 : i32
    %9 = arith.extui %8 : i1 to i32
    %c0_i32 = arith.constant 0 : i32
    %10 = arith.cmpi ne, %9, %c0_i32 : i32
    scf.if %10 {
      %cst = arith.constant 0.000000e+00 : f32
      %23 = vector.broadcast %cst : f32 to vector<2x8x128xf32>
      %c0 = arith.constant 0 : index
      %c0_7 = arith.constant 0 : index
      %c0_8 = arith.constant 0 : index
      %c0_9 = arith.constant 0 : index
      %c0_10 = arith.constant 0 : index
      %24 = vector.load %arg13[%c0, %c0_7, %c0_8, %c0_9, %c0_10] : memref<1x1x2x8x128xf32, #tpu.memory_space<vmem>>, vector<1x1x2x8x128xf32>
      %25 = vector.shape_cast %24 : vector<1x1x2x8x128xf32> to vector<2x8x128xf32>
      %26 = vector.shape_cast %23 : vector<2x8x128xf32> to vector<1x1x2x8x128xf32>
      tpu.vector_store %arg13[%c0, %c0_7, %c0_8, %c0_9, %c0_10], %26 {strides = array<i32>} : memref<1x1x2x8x128xf32, #tpu.memory_space<vmem>>, vector<1x1x2x8x128xf32>,
      %cst_11 = arith.constant 0.000000e+00 : f32
      %27 = vector.broadcast %cst_11 : f32 to vector<2x8x128xf32>
      %c0_12 = arith.constant 0 : index
      %c0_13 = arith.constant 0 : index
      %c0_14 = arith.constant 0 : index
      %c0_15 = arith.constant 0 : index
      %c0_16 = arith.constant 0 : index
      %28 = vector.load %arg14[%c0_12, %c0_13, %c0_14, %c0_15, %c0_16] : memref<1x1x2x8x128xf32, #tpu.memory_space<vmem>>, vector<1x1x2x8x128xf32>
      %29 = vector.shape_cast %28 : vector<1x1x2x8x128xf32> to vector<2x8x128xf32>
      %30 = vector.shape_cast %27 : vector<2x8x128xf32> to vector<1x1x2x8x128xf32>
      tpu.vector_store %arg14[%c0_12, %c0_13, %c0_14, %c0_15, %c0_16], %30 {strides = array<i32>} : memref<1x1x2x8x128xf32, #tpu.memory_space<vmem>>, vector<1x1x2x8x128xf32>,
      %cst_17 = arith.constant 0.000000e+00 : f32
      %31 = vector.broadcast %cst_17 : f32 to vector<2x8x128xf32>
      %c0_18 = arith.constant 0 : index
      %c0_19 = arith.constant 0 : index
      %c0_20 = arith.constant 0 : index
      %c0_21 = arith.constant 0 : index
      %c0_22 = arith.constant 0 : index
      %32 = vector.load %arg15[%c0_18, %c0_19, %c0_20, %c0_21, %c0_22] : memref<1x1x2x8x128xf32, #tpu.memory_space<vmem>>, vector<1x1x2x8x128xf32>
      %33 = vector.shape_cast %32 : vector<1x1x2x8x128xf32> to vector<2x8x128xf32>
      %34 = vector.shape_cast %31 : vector<2x8x128xf32> to vector<1x1x2x8x128xf32>
      tpu.vector_store %arg15[%c0_18, %c0_19, %c0_20, %c0_21, %c0_22], %34 {strides = array<i32>} : memref<1x1x2x8x128xf32, #tpu.memory_space<vmem>>, vector<1x1x2x8x128xf32>,
    } else {
    }
    %c0_i32_0 = arith.constant 0 : i32
    %11 = arith.cmpi eq, %3, %c0_i32_0 : i32
    %12 = arith.extui %11 : i1 to i32
    %c0_i32_1 = arith.constant 0 : i32
    %13 = arith.cmpi ne, %12, %c0_i32_1 : i32
    scf.if %13 {
      %c0 = arith.constant 0 : index
      %c0_7 = arith.constant 0 : index
      %c0_8 = arith.constant 0 : index
      %23 = vector.load %arg5[%c0, %c0_7, %c0_8] : memref<2x8x128xf32, #tpu.memory_space<vmem>>, vector<2x8x128xf32>
      %c0_9 = arith.constant 0 : index
      %c0_10 = arith.constant 0 : index
      %c0_11 = arith.constant 0 : index
      %24 = vector.load %arg9[%c0_9, %c0_10, %c0_11] : memref<2x8x128xf32, #tpu.memory_space<vmem>>, vector<2x8x128xf32>
      %25 = tpu.iota {dimensions = array<i32: 1>} : vector<2x8x128xi32>
      %26 = vector.broadcast %5 : i32 to vector<2x8x128xi32>
      %27 = arith.cmpi slt, %25, %26 : vector<2x8x128xi32>
      %cst = arith.constant 0.000000e+00 : f32
      %28 = vector.broadcast %cst : f32 to vector<2x8x128xf32>
      %29 = arith.select %27, %23, %28 : vector<2x8x128xi1>, vector<2x8x128xf32>
      %cst_12 = arith.constant 0.000000e+00 : f32
      %30 = vector.broadcast %cst_12 : f32 to vector<2x8x128xf32>
      %31 = arith.select %27, %24, %30 : vector<2x8x128xi1>, vector<2x8x128xf32>
      %32 = arith.mulf %29, %31 : vector<2x8x128xf32>
      %33 = arith.mulf %29, %29 : vector<2x8x128xf32>
      %34 = arith.mulf %31, %31 : vector<2x8x128xf32>
      %c0_13 = arith.constant 0 : index
      %c0_14 = arith.constant 0 : index
      %c0_15 = arith.constant 0 : index
      %c0_16 = arith.constant 0 : index
      %c0_17 = arith.constant 0 : index
      %35 = vector.load %arg13[%c0_13, %c0_14, %c0_15, %c0_16, %c0_17] : memref<1x1x2x8x128xf32, #tpu.memory_space<vmem>>, vector<1x1x2x8x128xf32>
      %36 = vector.shape_cast %35 : vector<1x1x2x8x128xf32> to vector<2x8x128xf32>
      %37 = vector.shape_cast %32 : vector<2x8x128xf32> to vector<2x1x8x128xf32>
      %cst_18 = arith.constant dense<0.000000e+00> : vector<2x8x128xf32>
      %38 = vector.multi_reduction <add>, %37, %cst_18 [1] : vector<2x1x8x128xf32> to vector<2x8x128xf32>
      %39 = arith.addf %36, %38 : vector<2x8x128xf32>
      %c0_19 = arith.constant 0 : index
      %c0_20 = arith.constant 0 : index
      %c0_21 = arith.constant 0 : index
      %c0_22 = arith.constant 0 : index
      %c0_23 = arith.constant 0 : index
      %40 = vector.load %arg13[%c0_19, %c0_20, %c0_21, %c0_22, %c0_23] : memref<1x1x2x8x128xf32, #tpu.memory_space<vmem>>, vector<1x1x2x8x128xf32>
      %41 = vector.shape_cast %40 : vector<1x1x2x8x128xf32> to vector<2x8x128xf32>
      %42 = vector.shape_cast %39 : vector<2x8x128xf32> to vector<1x1x2x8x128xf32>
      tpu.vector_store %arg13[%c0_19, %c0_20, %c0_21, %c0_22, %c0_23], %42 {strides = array<i32>} : memref<1x1x2x8x128xf32, #tpu.memory_space<vmem>>, vector<1x1x2x8x128xf32>,
      %c0_24 = arith.constant 0 : index
      %c0_25 = arith.constant 0 : index
      %c0_26 = arith.constant 0 : index
      %c0_27 = arith.constant 0 : index
      %c0_28 = arith.constant 0 : index
      %43 = vector.load %arg14[%c0_24, %c0_25, %c0_26, %c0_27, %c0_28] : memref<1x1x2x8x128xf32, #tpu.memory_space<vmem>>, vector<1x1x2x8x128xf32>
      %44 = vector.shape_cast %43 : vector<1x1x2x8x128xf32> to vector<2x8x128xf32>
      %45 = vector.shape_cast %33 : vector<2x8x128xf32> to vector<2x1x8x128xf32>
      %cst_29 = arith.constant dense<0.000000e+00> : vector<2x8x128xf32>
      %46 = vector.multi_reduction <add>, %45, %cst_29 [1] : vector<2x1x8x128xf32> to vector<2x8x128xf32>
      %47 = arith.addf %44, %46 : vector<2x8x128xf32>
      %c0_30 = arith.constant 0 : index
      %c0_31 = arith.constant 0 : index
      %c0_32 = arith.constant 0 : index
      %c0_33 = arith.constant 0 : index
      %c0_34 = arith.constant 0 : index
      %48 = vector.load %arg14[%c0_30, %c0_31, %c0_32, %c0_33, %c0_34] : memref<1x1x2x8x128xf32, #tpu.memory_space<vmem>>, vector<1x1x2x8x128xf32>
      %49 = vector.shape_cast %48 : vector<1x1x2x8x128xf32> to vector<2x8x128xf32>
      %50 = vector.shape_cast %47 : vector<2x8x128xf32> to vector<1x1x2x8x128xf32>
      tpu.vector_store %arg14[%c0_30, %c0_31, %c0_32, %c0_33, %c0_34], %50 {strides = array<i32>} : memref<1x1x2x8x128xf32, #tpu.memory_space<vmem>>, vector<1x1x2x8x128xf32>,
      %c0_35 = arith.constant 0 : index
      %c0_36 = arith.constant 0 : index
      %c0_37 = arith.constant 0 : index
      %c0_38 = arith.constant 0 : index
      %c0_39 = arith.constant 0 : index
      %51 = vector.load %arg15[%c0_35, %c0_36, %c0_37, %c0_38, %c0_39] : memref<1x1x2x8x128xf32, #tpu.memory_space<vmem>>, vector<1x1x2x8x128xf32>
      %52 = vector.shape_cast %51 : vector<1x1x2x8x128xf32> to vector<2x8x128xf32>
      %53 = vector.shape_cast %34 : vector<2x8x128xf32> to vector<2x1x8x128xf32>
      %cst_40 = arith.constant dense<0.000000e+00> : vector<2x8x128xf32>
      %54 = vector.multi_reduction <add>, %53, %cst_40 [1] : vector<2x1x8x128xf32> to vector<2x8x128xf32>
      %55 = arith.addf %52, %54 : vector<2x8x128xf32>
      %c0_41 = arith.constant 0 : index
      %c0_42 = arith.constant 0 : index
      %c0_43 = arith.constant 0 : index
      %c0_44 = arith.constant 0 : index
      %c0_45 = arith.constant 0 : index
      %56 = vector.load %arg15[%c0_41, %c0_42, %c0_43, %c0_44, %c0_45] : memref<1x1x2x8x128xf32, #tpu.memory_space<vmem>>, vector<1x1x2x8x128xf32>
      %57 = vector.shape_cast %56 : vector<1x1x2x8x128xf32> to vector<2x8x128xf32>
      %58 = vector.shape_cast %55 : vector<2x8x128xf32> to vector<1x1x2x8x128xf32>
      tpu.vector_store %arg15[%c0_41, %c0_42, %c0_43, %c0_44, %c0_45], %58 {strides = array<i32>} : memref<1x1x2x8x128xf32, #tpu.memory_space<vmem>>, vector<1x1x2x8x128xf32>,
    } else {
    }
    %c1_i32_2 = arith.constant 1 : i32
    %14 = arith.cmpi eq, %3, %c1_i32_2 : i32
    %15 = arith.extui %14 : i1 to i32
    %c0_i32_3 = arith.constant 0 : i32
    %16 = arith.cmpi ne, %15, %c0_i32_3 : i32
    scf.if %16 {
      %c0 = arith.constant 0 : index
      %c0_7 = arith.constant 0 : index
      %c0_8 = arith.constant 0 : index
      %23 = vector.load %arg6[%c0, %c0_7, %c0_8] : memref<2x4x128xf32, #tpu.memory_space<vmem>>, vector<2x4x128xf32>
      %c0_9 = arith.constant 0 : index
      %c0_10 = arith.constant 0 : index
      %c0_11 = arith.constant 0 : index
      %24 = vector.load %arg10[%c0_9, %c0_10, %c0_11] : memref<2x4x128xf32, #tpu.memory_space<vmem>>, vector<2x4x128xf32>
      %25 = tpu.iota {dimensions = array<i32: 1>} : vector<2x4x128xi32>
      %26 = vector.broadcast %5 : i32 to vector<2x4x128xi32>
      %27 = arith.cmpi slt, %25, %26 : vector<2x4x128xi32>
      %cst = arith.constant 0.000000e+00 : f32
      %28 = vector.broadcast %cst : f32 to vector<2x4x128xf32>
      %29 = arith.select %27, %23, %28 : vector<2x4x128xi1>, vector<2x4x128xf32>
      %cst_12 = arith.constant 0.000000e+00 : f32
      %30 = vector.broadcast %cst_12 : f32 to vector<2x4x128xf32>
      %31 = arith.select %27, %24, %30 : vector<2x4x128xi1>, vector<2x4x128xf32>
      %32 = arith.mulf %29, %31 : vector<2x4x128xf32>
      %33 = arith.mulf %29, %29 : vector<2x4x128xf32>
      %34 = arith.mulf %31, %31 : vector<2x4x128xf32>
      %c0_13 = arith.constant 0 : index
      %c0_14 = arith.constant 0 : index
      %c0_15 = arith.constant 0 : index
      %c0_16 = arith.constant 0 : index
      %c0_17 = arith.constant 0 : index
      %35 = vector.load %arg13[%c0_13, %c0_14, %c0_15, %c0_16, %c0_17] : memref<1x1x2x8x128xf32, #tpu.memory_space<vmem>>, vector<1x1x2x4x128xf32>
      %36 = vector.shape_cast %35 : vector<1x1x2x4x128xf32> to vector<2x4x128xf32>
      %37 = arith.addf %36, %32 : vector<2x4x128xf32>
      %c0_18 = arith.constant 0 : index
      %c0_19 = arith.constant 0 : index
      %c0_20 = arith.constant 0 : index
      %c0_21 = arith.constant 0 : index
      %c0_22 = arith.constant 0 : index
      %38 = vector.load %arg13[%c0_18, %c0_19, %c0_20, %c0_21, %c0_22] : memref<1x1x2x8x128xf32, #tpu.memory_space<vmem>>, vector<1x1x2x4x128xf32>
      %39 = vector.shape_cast %38 : vector<1x1x2x4x128xf32> to vector<2x4x128xf32>
      %40 = vector.shape_cast %37 : vector<2x4x128xf32> to vector<1x1x2x4x128xf32>
      tpu.vector_store %arg13[%c0_18, %c0_19, %c0_20, %c0_21, %c0_22], %40 {strides = array<i32>} : memref<1x1x2x8x128xf32, #tpu.memory_space<vmem>>, vector<1x1x2x4x128xf32>,
      %c0_23 = arith.constant 0 : index
      %c0_24 = arith.constant 0 : index
      %c0_25 = arith.constant 0 : index
      %c0_26 = arith.constant 0 : index
      %c0_27 = arith.constant 0 : index
      %41 = vector.load %arg14[%c0_23, %c0_24, %c0_25, %c0_26, %c0_27] : memref<1x1x2x8x128xf32, #tpu.memory_space<vmem>>, vector<1x1x2x4x128xf32>
      %42 = vector.shape_cast %41 : vector<1x1x2x4x128xf32> to vector<2x4x128xf32>
      %43 = arith.addf %42, %33 : vector<2x4x128xf32>
      %c0_28 = arith.constant 0 : index
      %c0_29 = arith.constant 0 : index
      %c0_30 = arith.constant 0 : index
      %c0_31 = arith.constant 0 : index
      %c0_32 = arith.constant 0 : index
      %44 = vector.load %arg14[%c0_28, %c0_29, %c0_30, %c0_31, %c0_32] : memref<1x1x2x8x128xf32, #tpu.memory_space<vmem>>, vector<1x1x2x4x128xf32>
      %45 = vector.shape_cast %44 : vector<1x1x2x4x128xf32> to vector<2x4x128xf32>
      %46 = vector.shape_cast %43 : vector<2x4x128xf32> to vector<1x1x2x4x128xf32>
      tpu.vector_store %arg14[%c0_28, %c0_29, %c0_30, %c0_31, %c0_32], %46 {strides = array<i32>} : memref<1x1x2x8x128xf32, #tpu.memory_space<vmem>>, vector<1x1x2x4x128xf32>,
      %c0_33 = arith.constant 0 : index
      %c0_34 = arith.constant 0 : index
      %c0_35 = arith.constant 0 : index
      %c0_36 = arith.constant 0 : index
      %c0_37 = arith.constant 0 : index
      %47 = vector.load %arg15[%c0_33, %c0_34, %c0_35, %c0_36, %c0_37] : memref<1x1x2x8x128xf32, #tpu.memory_space<vmem>>, vector<1x1x2x4x128xf32>
      %48 = vector.shape_cast %47 : vector<1x1x2x4x128xf32> to vector<2x4x128xf32>
      %49 = arith.addf %48, %34 : vector<2x4x128xf32>
      %c0_38 = arith.constant 0 : index
      %c0_39 = arith.constant 0 : index
      %c0_40 = arith.constant 0 : index
      %c0_41 = arith.constant 0 : index
      %c0_42 = arith.constant 0 : index
      %50 = vector.load %arg15[%c0_38, %c0_39, %c0_40, %c0_41, %c0_42] : memref<1x1x2x8x128xf32, #tpu.memory_space<vmem>>, vector<1x1x2x4x128xf32>
      %51 = vector.shape_cast %50 : vector<1x1x2x4x128xf32> to vector<2x4x128xf32>
      %52 = vector.shape_cast %49 : vector<2x4x128xf32> to vector<1x1x2x4x128xf32>
      tpu.vector_store %arg15[%c0_38, %c0_39, %c0_40, %c0_41, %c0_42], %52 {strides = array<i32>} : memref<1x1x2x8x128xf32, #tpu.memory_space<vmem>>, vector<1x1x2x4x128xf32>,
    } else {
    }
    %c2_i32 = arith.constant 2 : i32
    %17 = arith.cmpi eq, %3, %c2_i32 : i32
    %18 = arith.extui %17 : i1 to i32
    %c0_i32_4 = arith.constant 0 : i32
    %19 = arith.cmpi ne, %18, %c0_i32_4 : i32
    scf.if %19 {
      %c0 = arith.constant 0 : index
      %c0_7 = arith.constant 0 : index
      %c0_8 = arith.constant 0 : index
      %23 = vector.load %arg7[%c0, %c0_7, %c0_8] : memref<2x3x128xf32, #tpu.memory_space<vmem>>, vector<2x3x128xf32>
      %c0_9 = arith.constant 0 : index
      %c0_10 = arith.constant 0 : index
      %c0_11 = arith.constant 0 : index
      %24 = vector.load %arg11[%c0_9, %c0_10, %c0_11] : memref<2x3x128xf32, #tpu.memory_space<vmem>>, vector<2x3x128xf32>
      %25 = tpu.iota {dimensions = array<i32: 1>} : vector<2x3x128xi32>
      %26 = vector.broadcast %5 : i32 to vector<2x3x128xi32>
      %27 = arith.cmpi slt, %25, %26 : vector<2x3x128xi32>
      %cst = arith.constant 0.000000e+00 : f32
      %28 = vector.broadcast %cst : f32 to vector<2x3x128xf32>
      %29 = arith.select %27, %23, %28 : vector<2x3x128xi1>, vector<2x3x128xf32>
      %cst_12 = arith.constant 0.000000e+00 : f32
      %30 = vector.broadcast %cst_12 : f32 to vector<2x3x128xf32>
      %31 = arith.select %27, %24, %30 : vector<2x3x128xi1>, vector<2x3x128xf32>
      %32 = arith.mulf %29, %31 : vector<2x3x128xf32>
      %33 = arith.mulf %29, %29 : vector<2x3x128xf32>
      %34 = arith.mulf %31, %31 : vector<2x3x128xf32>
      %c0_13 = arith.constant 0 : index
      %c0_14 = arith.constant 0 : index
      %c0_15 = arith.constant 0 : index
      %c0_16 = arith.constant 0 : index
      %c0_17 = arith.constant 0 : index
      %35 = vector.load %arg13[%c0_13, %c0_14, %c0_15, %c0_16, %c0_17] : memref<1x1x2x8x128xf32, #tpu.memory_space<vmem>>, vector<1x1x2x3x128xf32>
      %36 = vector.shape_cast %35 : vector<1x1x2x3x128xf32> to vector<2x3x128xf32>
      %37 = arith.addf %36, %32 : vector<2x3x128xf32>
      %c0_18 = arith.constant 0 : index
      %c0_19 = arith.constant 0 : index
      %c0_20 = arith.constant 0 : index
      %c0_21 = arith.constant 0 : index
      %c0_22 = arith.constant 0 : index
      %38 = vector.load %arg13[%c0_18, %c0_19, %c0_20, %c0_21, %c0_22] : memref<1x1x2x8x128xf32, #tpu.memory_space<vmem>>, vector<1x1x2x3x128xf32>
      %39 = vector.shape_cast %38 : vector<1x1x2x3x128xf32> to vector<2x3x128xf32>
      %40 = vector.shape_cast %37 : vector<2x3x128xf32> to vector<1x1x2x3x128xf32>
      tpu.vector_store %arg13[%c0_18, %c0_19, %c0_20, %c0_21, %c0_22], %40 {strides = array<i32>} : memref<1x1x2x8x128xf32, #tpu.memory_space<vmem>>, vector<1x1x2x3x128xf32>,
      %c0_23 = arith.constant 0 : index
      %c0_24 = arith.constant 0 : index
      %c0_25 = arith.constant 0 : index
      %c0_26 = arith.constant 0 : index
      %c0_27 = arith.constant 0 : index
      %41 = vector.load %arg14[%c0_23, %c0_24, %c0_25, %c0_26, %c0_27] : memref<1x1x2x8x128xf32, #tpu.memory_space<vmem>>, vector<1x1x2x3x128xf32>
      %42 = vector.shape_cast %41 : vector<1x1x2x3x128xf32> to vector<2x3x128xf32>
      %43 = arith.addf %42, %33 : vector<2x3x128xf32>
      %c0_28 = arith.constant 0 : index
      %c0_29 = arith.constant 0 : index
      %c0_30 = arith.constant 0 : index
      %c0_31 = arith.constant 0 : index
      %c0_32 = arith.constant 0 : index
      %44 = vector.load %arg14[%c0_28, %c0_29, %c0_30, %c0_31, %c0_32] : memref<1x1x2x8x128xf32, #tpu.memory_space<vmem>>, vector<1x1x2x3x128xf32>
      %45 = vector.shape_cast %44 : vector<1x1x2x3x128xf32> to vector<2x3x128xf32>
      %46 = vector.shape_cast %43 : vector<2x3x128xf32> to vector<1x1x2x3x128xf32>
      tpu.vector_store %arg14[%c0_28, %c0_29, %c0_30, %c0_31, %c0_32], %46 {strides = array<i32>} : memref<1x1x2x8x128xf32, #tpu.memory_space<vmem>>, vector<1x1x2x3x128xf32>,
      %c0_33 = arith.constant 0 : index
      %c0_34 = arith.constant 0 : index
      %c0_35 = arith.constant 0 : index
      %c0_36 = arith.constant 0 : index
      %c0_37 = arith.constant 0 : index
      %47 = vector.load %arg15[%c0_33, %c0_34, %c0_35, %c0_36, %c0_37] : memref<1x1x2x8x128xf32, #tpu.memory_space<vmem>>, vector<1x1x2x3x128xf32>
      %48 = vector.shape_cast %47 : vector<1x1x2x3x128xf32> to vector<2x3x128xf32>
      %49 = arith.addf %48, %34 : vector<2x3x128xf32>
      %c0_38 = arith.constant 0 : index
      %c0_39 = arith.constant 0 : index
      %c0_40 = arith.constant 0 : index
      %c0_41 = arith.constant 0 : index
      %c0_42 = arith.constant 0 : index
      %50 = vector.load %arg15[%c0_38, %c0_39, %c0_40, %c0_41, %c0_42] : memref<1x1x2x8x128xf32, #tpu.memory_space<vmem>>, vector<1x1x2x3x128xf32>
      %51 = vector.shape_cast %50 : vector<1x1x2x3x128xf32> to vector<2x3x128xf32>
      %52 = vector.shape_cast %49 : vector<2x3x128xf32> to vector<1x1x2x3x128xf32>
      tpu.vector_store %arg15[%c0_38, %c0_39, %c0_40, %c0_41, %c0_42], %52 {strides = array<i32>} : memref<1x1x2x8x128xf32, #tpu.memory_space<vmem>>, vector<1x1x2x3x128xf32>,
    } else {
    }
    %c3_i32_5 = arith.constant 3 : i32
    %20 = arith.cmpi eq, %3, %c3_i32_5 : i32
    %21 = arith.extui %20 : i1 to i32
    %c0_i32_6 = arith.constant 0 : i32
    %22 = arith.cmpi ne, %21, %c0_i32_6 : i32
    scf.if %22 {
      %c0 = arith.constant 0 : index
      %c0_7 = arith.constant 0 : index
      %c0_8 = arith.constant 0 : index
      %23 = vector.load %arg8[%c0, %c0_7, %c0_8] : memref<2x16x128xf32, #tpu.memory_space<vmem>>, vector<2x16x128xf32>
      %c0_9 = arith.constant 0 : index
      %c0_10 = arith.constant 0 : index
      %c0_11 = arith.constant 0 : index
      %24 = vector.load %arg12[%c0_9, %c0_10, %c0_11] : memref<2x16x128xf32, #tpu.memory_space<vmem>>, vector<2x16x128xf32>
      %25 = tpu.iota {dimensions = array<i32: 1>} : vector<2x16x128xi32>
      %26 = vector.broadcast %5 : i32 to vector<2x16x128xi32>
      %27 = arith.cmpi slt, %25, %26 : vector<2x16x128xi32>
      %cst = arith.constant 0.000000e+00 : f32
      %28 = vector.broadcast %cst : f32 to vector<2x16x128xf32>
      %29 = arith.select %27, %23, %28 : vector<2x16x128xi1>, vector<2x16x128xf32>
      %cst_12 = arith.constant 0.000000e+00 : f32
      %30 = vector.broadcast %cst_12 : f32 to vector<2x16x128xf32>
      %31 = arith.select %27, %24, %30 : vector<2x16x128xi1>, vector<2x16x128xf32>
      %32 = arith.mulf %29, %31 : vector<2x16x128xf32>
      %33 = arith.mulf %29, %29 : vector<2x16x128xf32>
      %34 = arith.mulf %31, %31 : vector<2x16x128xf32>
      %c0_13 = arith.constant 0 : index
      %c0_14 = arith.constant 0 : index
      %c0_15 = arith.constant 0 : index
      %c0_16 = arith.constant 0 : index
      %c0_17 = arith.constant 0 : index
      %35 = vector.load %arg13[%c0_13, %c0_14, %c0_15, %c0_16, %c0_17] : memref<1x1x2x8x128xf32, #tpu.memory_space<vmem>>, vector<1x1x2x8x128xf32>
      %36 = vector.shape_cast %35 : vector<1x1x2x8x128xf32> to vector<2x8x128xf32>
      %37 = vector.shape_cast %32 : vector<2x16x128xf32> to vector<2x2x8x128xf32>
      %cst_18 = arith.constant dense<0.000000e+00> : vector<2x8x128xf32>
      %38 = vector.multi_reduction <add>, %37, %cst_18 [1] : vector<2x2x8x128xf32> to vector<2x8x128xf32>
      %39 = arith.addf %36, %38 : vector<2x8x128xf32>
      %c0_19 = arith.constant 0 : index
      %c0_20 = arith.constant 0 : index
      %c0_21 = arith.constant 0 : index
      %c0_22 = arith.constant 0 : index
      %c0_23 = arith.constant 0 : index
      %40 = vector.load %arg13[%c0_19, %c0_20, %c0_21, %c0_22, %c0_23] : memref<1x1x2x8x128xf32, #tpu.memory_space<vmem>>, vector<1x1x2x8x128xf32>
      %41 = vector.shape_cast %40 : vector<1x1x2x8x128xf32> to vector<2x8x128xf32>
      %42 = vector.shape_cast %39 : vector<2x8x128xf32> to vector<1x1x2x8x128xf32>
      tpu.vector_store %arg13[%c0_19, %c0_20, %c0_21, %c0_22, %c0_23], %42 {strides = array<i32>} : memref<1x1x2x8x128xf32, #tpu.memory_space<vmem>>, vector<1x1x2x8x128xf32>,
      %c0_24 = arith.constant 0 : index
      %c0_25 = arith.constant 0 : index
      %c0_26 = arith.constant 0 : index
      %c0_27 = arith.constant 0 : index
      %c0_28 = arith.constant 0 : index
      %43 = vector.load %arg14[%c0_24, %c0_25, %c0_26, %c0_27, %c0_28] : memref<1x1x2x8x128xf32, #tpu.memory_space<vmem>>, vector<1x1x2x8x128xf32>
      %44 = vector.shape_cast %43 : vector<1x1x2x8x128xf32> to vector<2x8x128xf32>
      %45 = vector.shape_cast %33 : vector<2x16x128xf32> to vector<2x2x8x128xf32>
      %cst_29 = arith.constant dense<0.000000e+00> : vector<2x8x128xf32>
      %46 = vector.multi_reduction <add>, %45, %cst_29 [1] : vector<2x2x8x128xf32> to vector<2x8x128xf32>
      %47 = arith.addf %44, %46 : vector<2x8x128xf32>
      %c0_30 = arith.constant 0 : index
      %c0_31 = arith.constant 0 : index
      %c0_32 = arith.constant 0 : index
      %c0_33 = arith.constant 0 : index
      %c0_34 = arith.constant 0 : index
      %48 = vector.load %arg14[%c0_30, %c0_31, %c0_32, %c0_33, %c0_34] : memref<1x1x2x8x128xf32, #tpu.memory_space<vmem>>, vector<1x1x2x8x128xf32>
      %49 = vector.shape_cast %48 : vector<1x1x2x8x128xf32> to vector<2x8x128xf32>
      %50 = vector.shape_cast %47 : vector<2x8x128xf32> to vector<1x1x2x8x128xf32>
      tpu.vector_store %arg14[%c0_30, %c0_31, %c0_32, %c0_33, %c0_34], %50 {strides = array<i32>} : memref<1x1x2x8x128xf32, #tpu.memory_space<vmem>>, vector<1x1x2x8x128xf32>,
      %c0_35 = arith.constant 0 : index
      %c0_36 = arith.constant 0 : index
      %c0_37 = arith.constant 0 : index
      %c0_38 = arith.constant 0 : index
      %c0_39 = arith.constant 0 : index
      %51 = vector.load %arg15[%c0_35, %c0_36, %c0_37, %c0_38, %c0_39] : memref<1x1x2x8x128xf32, #tpu.memory_space<vmem>>, vector<1x1x2x8x128xf32>
      %52 = vector.shape_cast %51 : vector<1x1x2x8x128xf32> to vector<2x8x128xf32>
      %53 = vector.shape_cast %34 : vector<2x16x128xf32> to vector<2x2x8x128xf32>
      %cst_40 = arith.constant dense<0.000000e+00> : vector<2x8x128xf32>
      %54 = vector.multi_reduction <add>, %53, %cst_40 [1] : vector<2x2x8x128xf32> to vector<2x8x128xf32>
      %55 = arith.addf %52, %54 : vector<2x8x128xf32>
      %c0_41 = arith.constant 0 : index
      %c0_42 = arith.constant 0 : index
      %c0_43 = arith.constant 0 : index
      %c0_44 = arith.constant 0 : index
      %c0_45 = arith.constant 0 : index
      %56 = vector.load %arg15[%c0_41, %c0_42, %c0_43, %c0_44, %c0_45] : memref<1x1x2x8x128xf32, #tpu.memory_space<vmem>>, vector<1x1x2x8x128xf32>
      %57 = vector.shape_cast %56 : vector<1x1x2x8x128xf32> to vector<2x8x128xf32>
      %58 = vector.shape_cast %55 : vector<2x8x128xf32> to vector<1x1x2x8x128xf32>
      tpu.vector_store %arg15[%c0_41, %c0_42, %c0_43, %c0_44, %c0_45], %58 {strides = array<i32>} : memref<1x1x2x8x128xf32, #tpu.memory_space<vmem>>, vector<1x1x2x8x128xf32>,
    } else {
    }
    return
  }
  func.func @transform_0(%arg0: i32, %arg1: i32, %arg2: memref<6xi32, #tpu.memory_space<smem>>, %arg3: memref<6xi32, #tpu.memory_space<smem>>, %arg4: memref<6xi32, #tpu.memory_space<smem>>) -> (i32, i32, i32) {
    %c3_i32 = arith.constant 3 : i32
    %0 = arith.muli %arg0, %c3_i32 : i32
    %1 = arith.addi %0, %arg1 : i32
    %c0_i32 = arith.constant 0 : i32
    %2 = arith.subi %1, %c0_i32 : i32
    %c0_i32_0 = arith.constant 0 : i32
    %c0_i32_1 = arith.constant 0 : i32
    %3 = arith.maxsi %c0_i32_0, %2 : i32
    %4 = arith.minsi %c0_i32_1, %3 : i32
    %c0_i32_2 = arith.constant 0 : i32
    %c0_i32_3 = arith.constant 0 : i32
    %c0_i32_4 = arith.constant 0 : i32
    return %c0_i32_2, %4, %c0_i32_3 : i32, i32, i32
  }
  func.func @transform_1(%arg0: i32, %arg1: i32, %arg2: memref<6xi32, #tpu.memory_space<smem>>, %arg3: memref<6xi32, #tpu.memory_space<smem>>, %arg4: memref<6xi32, #tpu.memory_space<smem>>) -> (i32, i32, i32) {
    %c3_i32 = arith.constant 3 : i32
    %0 = arith.muli %arg0, %c3_i32 : i32
    %1 = arith.addi %0, %arg1 : i32
    %c1_i32 = arith.constant 1 : i32
    %2 = arith.subi %1, %c1_i32 : i32
    %c0_i32 = arith.constant 0 : i32
    %c0_i32_0 = arith.constant 0 : i32
    %3 = arith.maxsi %c0_i32, %2 : i32
    %4 = arith.minsi %c0_i32_0, %3 : i32
    %c0_i32_1 = arith.constant 0 : i32
    %c0_i32_2 = arith.constant 0 : i32
    %c0_i32_3 = arith.constant 0 : i32
    return %c0_i32_1, %4, %c0_i32_2 : i32, i32, i32
  }
  func.func @transform_2(%arg0: i32, %arg1: i32, %arg2: memref<6xi32, #tpu.memory_space<smem>>, %arg3: memref<6xi32, #tpu.memory_space<smem>>, %arg4: memref<6xi32, #tpu.memory_space<smem>>) -> (i32, i32, i32) {
    %c3_i32 = arith.constant 3 : i32
    %0 = arith.muli %arg0, %c3_i32 : i32
    %1 = arith.addi %0, %arg1 : i32
    %c2_i32 = arith.constant 2 : i32
    %2 = arith.subi %1, %c2_i32 : i32
    %c0_i32 = arith.constant 0 : i32
    %c0_i32_0 = arith.constant 0 : i32
    %3 = arith.maxsi %c0_i32, %2 : i32
    %4 = arith.minsi %c0_i32_0, %3 : i32
    %c0_i32_1 = arith.constant 0 : i32
    %c0_i32_2 = arith.constant 0 : i32
    %c0_i32_3 = arith.constant 0 : i32
    return %c0_i32_1, %4, %c0_i32_2 : i32, i32, i32
  }
  func.func @transform_3(%arg0: i32, %arg1: i32, %arg2: memref<6xi32, #tpu.memory_space<smem>>, %arg3: memref<6xi32, #tpu.memory_space<smem>>, %arg4: memref<6xi32, #tpu.memory_space<smem>>) -> (i32, i32, i32) {
    %c3_i32 = arith.constant 3 : i32
    %0 = arith.muli %arg0, %c3_i32 : i32
    %1 = arith.addi %0, %arg1 : i32
    %c3_i32_0 = arith.constant 3 : i32
    %2 = arith.subi %1, %c3_i32_0 : i32
    %c0_i32 = arith.constant 0 : i32
    %c1_i32 = arith.constant 1 : i32
    %3 = arith.maxsi %c0_i32, %2 : i32
    %4 = arith.minsi %c1_i32, %3 : i32
    %c0_i32_1 = arith.constant 0 : i32
    %c0_i32_2 = arith.constant 0 : i32
    %c0_i32_3 = arith.constant 0 : i32
    return %c0_i32_1, %4, %c0_i32_2 : i32, i32, i32
  }
  func.func @transform_4(%arg0: i32, %arg1: i32, %arg2: memref<6xi32, #tpu.memory_space<smem>>, %arg3: memref<6xi32, #tpu.memory_space<smem>>, %arg4: memref<6xi32, #tpu.memory_space<smem>>) -> (i32, i32, i32) {
    %c3_i32 = arith.constant 3 : i32
    %0 = arith.muli %arg0, %c3_i32 : i32
    %1 = arith.addi %0, %arg1 : i32
    %c0_i32 = arith.constant 0 : i32
    %2 = arith.subi %1, %c0_i32 : i32
    %c0_i32_0 = arith.constant 0 : i32
    %c0_i32_1 = arith.constant 0 : i32
    %3 = arith.maxsi %c0_i32_0, %2 : i32
    %4 = arith.minsi %c0_i32_1, %3 : i32
    %c0_i32_2 = arith.constant 0 : i32
    %c0_i32_3 = arith.constant 0 : i32
    %c0_i32_4 = arith.constant 0 : i32
    return %c0_i32_2, %4, %c0_i32_3 : i32, i32, i32
  }
  func.func @transform_5(%arg0: i32, %arg1: i32, %arg2: memref<6xi32, #tpu.memory_space<smem>>, %arg3: memref<6xi32, #tpu.memory_space<smem>>, %arg4: memref<6xi32, #tpu.memory_space<smem>>) -> (i32, i32, i32) {
    %c3_i32 = arith.constant 3 : i32
    %0 = arith.muli %arg0, %c3_i32 : i32
    %1 = arith.addi %0, %arg1 : i32
    %c1_i32 = arith.constant 1 : i32
    %2 = arith.subi %1, %c1_i32 : i32
    %c0_i32 = arith.constant 0 : i32
    %c0_i32_0 = arith.constant 0 : i32
    %3 = arith.maxsi %c0_i32, %2 : i32
    %4 = arith.minsi %c0_i32_0, %3 : i32
    %c0_i32_1 = arith.constant 0 : i32
    %c0_i32_2 = arith.constant 0 : i32
    %c0_i32_3 = arith.constant 0 : i32
    return %c0_i32_1, %4, %c0_i32_2 : i32, i32, i32
  }
  func.func @transform_6(%arg0: i32, %arg1: i32, %arg2: memref<6xi32, #tpu.memory_space<smem>>, %arg3: memref<6xi32, #tpu.memory_space<smem>>, %arg4: memref<6xi32, #tpu.memory_space<smem>>) -> (i32, i32, i32) {
    %c3_i32 = arith.constant 3 : i32
    %0 = arith.muli %arg0, %c3_i32 : i32
    %1 = arith.addi %0, %arg1 : i32
    %c2_i32 = arith.constant 2 : i32
    %2 = arith.subi %1, %c2_i32 : i32
    %c0_i32 = arith.constant 0 : i32
    %c0_i32_0 = arith.constant 0 : i32
    %3 = arith.maxsi %c0_i32, %2 : i32
    %4 = arith.minsi %c0_i32_0, %3 : i32
    %c0_i32_1 = arith.constant 0 : i32
    %c0_i32_2 = arith.constant 0 : i32
    %c0_i32_3 = arith.constant 0 : i32
    return %c0_i32_1, %4, %c0_i32_2 : i32, i32, i32
  }
  func.func @transform_7(%arg0: i32, %arg1: i32, %arg2: memref<6xi32, #tpu.memory_space<smem>>, %arg3: memref<6xi32, #tpu.memory_space<smem>>, %arg4: memref<6xi32, #tpu.memory_space<smem>>) -> (i32, i32, i32) {
    %c3_i32 = arith.constant 3 : i32
    %0 = arith.muli %arg0, %c3_i32 : i32
    %1 = arith.addi %0, %arg1 : i32
    %c3_i32_0 = arith.constant 3 : i32
    %2 = arith.subi %1, %c3_i32_0 : i32
    %c0_i32 = arith.constant 0 : i32
    %c1_i32 = arith.constant 1 : i32
    %3 = arith.maxsi %c0_i32, %2 : i32
    %4 = arith.minsi %c1_i32, %3 : i32
    %c0_i32_1 = arith.constant 0 : i32
    %c0_i32_2 = arith.constant 0 : i32
    %c0_i32_3 = arith.constant 0 : i32
    return %c0_i32_1, %4, %c0_i32_2 : i32, i32, i32
  }
  func.func @transform_8(%arg0: i32, %arg1: i32, %arg2: memref<6xi32, #tpu.memory_space<smem>>, %arg3: memref<6xi32, #tpu.memory_space<smem>>, %arg4: memref<6xi32, #tpu.memory_space<smem>>) -> (i32, i32, i32, i32, i32) {
    %c3_i32 = arith.constant 3 : i32
    %0 = arith.muli %arg0, %c3_i32 : i32
    %1 = arith.addi %0, %arg1 : i32
    %2 = arith.index_cast %1 : i32 to index
    %3 = memref.load %arg2[%2] : memref<6xi32, #tpu.memory_space<smem>>
    %c0_i32 = arith.constant 0 : i32
    %c0_i32_0 = arith.constant 0 : i32
    %c0_i32_1 = arith.constant 0 : i32
    %c0_i32_2 = arith.constant 0 : i32
    return %arg0, %3, %c0_i32, %c0_i32_0, %c0_i32_1 : i32, i32, i32, i32, i32
  }
  func.func @transform_9(%arg0: i32, %arg1: i32, %arg2: memref<6xi32, #tpu.memory_space<smem>>, %arg3: memref<6xi32, #tpu.memory_space<smem>>, %arg4: memref<6xi32, #tpu.memory_space<smem>>) -> (i32, i32, i32, i32, i32) {
    %c3_i32 = arith.constant 3 : i32
    %0 = arith.muli %arg0, %c3_i32 : i32
    %1 = arith.addi %0, %arg1 : i32
    %2 = arith.index_cast %1 : i32 to index
    %3 = memref.load %arg2[%2] : memref<6xi32, #tpu.memory_space<smem>>
    %c0_i32 = arith.constant 0 : i32
    %c0_i32_0 = arith.constant 0 : i32
    %c0_i32_1 = arith.constant 0 : i32
    %c0_i32_2 = arith.constant 0 : i32
    return %arg0, %3, %c0_i32, %c0_i32_0, %c0_i32_1 : i32, i32, i32, i32, i32
  }
  func.func @transform_10(%arg0: i32, %arg1: i32, %arg2: memref<6xi32, #tpu.memory_space<smem>>, %arg3: memref<6xi32, #tpu.memory_space<smem>>, %arg4: memref<6xi32, #tpu.memory_space<smem>>) -> (i32, i32, i32, i32, i32) {
    %c3_i32 = arith.constant 3 : i32
    %0 = arith.muli %arg0, %c3_i32 : i32
    %1 = arith.addi %0, %arg1 : i32
    %2 = arith.index_cast %1 : i32 to index
    %3 = memref.load %arg2[%2] : memref<6xi32, #tpu.memory_space<smem>>
    %c0_i32 = arith.constant 0 : i32
    %c0_i32_0 = arith.constant 0 : i32
    %c0_i32_1 = arith.constant 0 : i32
    %c0_i32_2 = arith.constant 0 : i32
    return %arg0, %3, %c0_i32, %c0_i32_0, %c0_i32_1 : i32, i32, i32, i32, i32
  }
}

</mosaic_0001>

<bundles_post_ra>
// kernel: _distill_forward.1
= control target key start
LH: loop header
LB: loop body
LE: loop exit
PB: predicated region body
PF: predicated region fallthrough
CT: control target
= control target key end

     0   :  { %s2860_s0 = inlined_call_operand.vmem [shape: s32[6], index: 0, kind: input, shape index: {}]   ;;  %s2861_s3 = inlined_call_operand.vmem [shape: f32[2,8,128], index: 3, kind: input, shape index: {}]   ;;  %s2862_s4 = inlined_call_operand.vmem [shape: f32[2,4,128], index: 4, kind: input, shape index: {}]   ;;  %s2863_s5 = inlined_call_operand.vmem [shape: f32[2,3,128], index: 5, kind: input, shape index: {}]   ;;  %s2864_s6 = inlined_call_operand.vmem [shape: f32[2,20,128], index: 6, kind: input, shape index: {}]   ;;  %s2865_s7 = inlined_call_operand.vmem [shape: f32[2,8,128], index: 7, kind: input, shape index: {}]   ;;  %s2866_s8 = inlined_call_operand.vmem [shape: f32[2,4,128], index: 8, kind: input, shape index: {}]   ;;  %s2867_s9 = inlined_call_operand.vmem [shape: f32[2,3,128], index: 9, kind: input, shape index: {}]   ;;  %s2868_s10 = inlined_call_operand.vmem [shape: f32[2,20,128], index: 10, kind: input, shape index: {}]   ;;  %s2869_s11 = inlined_call_operand.vmem [shape: f32[2,4,2,8,128], index: 11, kind: output, shape index: {0}]   ;;  %s2870_s12 = inlined_call_operand.vmem [shape: f32[2,4,2,8,128], index: 12, kind: output, shape index: {1}]   ;;  %s2871_s13 = inlined_call_operand.vmem [shape: f32[2,4,2,8,128], index: 13, kind: output, shape index: {2}]   ;;  %s2872_s1 = inlined_call_operand.vmem [shape: s32[6], index: 1, kind: input, shape index: {}]   ;;  %s2873_s2 = inlined_call_operand.vmem [shape: s32[6], index: 2, kind: input, shape index: {}]  }
   0x1   :  { %2881 = sst [smem:[#allocation16_spill]] %s2864_s6  ;;  %s19_s27 = sshll.u32 %s2860_s0, 4  ;;  %s20_s27 = int_to_ptr.vmem [resolvable:$true] %s19_s27 }
   0x2   :  { %2882 = sst [smem:[#allocation17_spill]] %s2867_s9  ;;  %s23_s30 = sshll.u32 %s2872_s1, 4  ;;  %s24_s30 = int_to_ptr.vmem [resolvable:$true] %s23_s30 }
   0x3   :  { %2883 = sst [smem:[#allocation18_spill]] %s2868_s10  ;;  %s2227_s14 = scalar_lea.vmem %s20_s27, 16 }
   0x4   :  { %p2228_p0 = scmp.ne.s32.totalorder %s20_s27, %s2227_s14  ;;  %p2232_p1 = scmp.lt.s32.totalorder %s20_s27, %s20_s27 }
   0x5   :  { %p2233_p2 = scmp.lt.s32.totalorder %s2227_s14, %s2227_s14 }
   0x7   :  { %p2234_p3 = por %p2233_p2, %p2232_p1 }
   0x9   :  { %p2235_p4 = pnand %p2234_p3, %p2228_p0 }
   0xb   :  { %2238 = shalt.err (!%p2235_p4)  }
   0xc   :  { %s2449_s15 = smov [#allocation3]   ;;  %s2239_s16 = scalar_lea.vmem %s24_s30, 16 }
   0xd   :  { %22 = dma.vmem_to_smem %s20_s27, 16, %s2449_s15, [#allocation2] }
   0xe   :  { %p2240_p5 = scmp.ne.s32.totalorder %s24_s30, %s2239_s16  ;;  %p2244_p6 = scmp.lt.s32.totalorder %s24_s30, %s24_s30 }
   0xf   :  { %p2245_p7 = scmp.lt.s32.totalorder %s2239_s16, %s2239_s16 }
  0x11   :  { %p2246_p8 = por %p2245_p7, %p2244_p6 }
  0x13   :  { %p2247_p9 = pnand %p2246_p8, %p2240_p5 }
  0x15   :  { %2250 = shalt.err (!%p2247_p9)  }
  0x16   :  { %s2450_s0 = smov [#allocation4]   ;;  %s27_s18 = sshll.u32 %s2873_s2, 4  ;;  %s28_s18 = int_to_ptr.vmem [resolvable:$true] %s27_s18 }
  0x17   :  { %26 = dma.vmem_to_smem %s24_s30, 16, %s2450_s0, [#allocation2] }
  0x18   :  { %s2251_s19 = scalar_lea.vmem %s28_s18, 16  ;;  %p2256_p11 = scmp.lt.s32.totalorder %s28_s18, %s28_s18 }
  0x19   :  { %p2252_p10 = scmp.ne.s32.totalorder %s28_s18, %s2251_s19  ;;  %p2257_p12 = scmp.lt.s32.totalorder %s2251_s19, %s2251_s19 }
  0x1b   :  { %p2258_p13 = por %p2257_p12, %p2256_p11 }
  0x1d   :  { %p2259_p0 = pnand %p2258_p13, %p2252_p10 }
  0x1f   :  { %2262 = shalt.err (!%p2259_p0)  }
  0x20   :  { %s2451_s20 = smov [#allocation5]  }
  0x21   :  { %30 = dma.vmem_to_smem %s28_s18, 16, %s2451_s20, [#allocation2] }
  0x22   :  { %2355 = dma.done.wait [#allocation2], 48 }
  0x23   :  { %2356 = vsyncadd [#allocation2], 4294967248 }
  0x24   :  { %32 = sfence }
  0x25   :  { %s2532_s21 = smov 0   ;;  %s2534_s22 = smov 0  }
  0x26   :  { %s2536_s23 = smov 0   ;;  %s2538_s2 = smov 0  }
  0x27   :  { %s2540_s24 = smov 0   ;;  %s2542_s25 = smov 0  }
  0x28   :  { %s2544_s26 = smov 0  }
  0x29 LB: > { %2884 = sst [smem:[#allocation9_spill]] %s2363_s22  ;;  %s47_s27 = sadd.s32 1, %s2375_s24  ;;  %s2383_s26 = sphi %s2544_s26, %s38_s26   ;;  %s2379_s25 = sphi %s2542_s25, %s2907_s25   ;;  %s2375_s24 = sphi %s2540_s24, %s2906_s24   ;;  %s2371_s2 = sphi %s2538_s2, %s2905_s2   ;;  %s2367_s23 = sphi %s2536_s23, %s2904_s23   ;;  %s2363_s22 = sphi %s2534_s22, %s2903_s22   ;;  %s2359_s21 = sphi %s2532_s21, %s2902_s21  }
  0x2a   : > { %2885 = sst [smem:[#allocation10_spill]] %s2375_s24  ;;  %s50_s28 = sadd.s32 1, %s2379_s25 }
  0x2b   : > { %2886 = sst [smem:[#allocation11_spill]] %s2379_s25  ;;  %p48_p1 = scmp.ge.s32.totalorder %s47_s27, 3 }
  0x2c   : > { %2887 = sst [smem:[#allocation12_spill]] %s2383_s26  ;;  %s172_s29 = smul.u32 3, %s2379_s25 }
  0x2d   : > { %p196_p2 = scmp.ne.s32.totalorder %s2363_s22, %s2359_s21  ;;  %s2909_s27 = smov (%p48_p1, %s47_s27), 0 }
  0x2e   : > { %2888 = sst [smem:[#allocation13_spill]] %s2909_s27  ;;  %s2911_s28 = smov (!%p48_p1, %s50_s28), %s2379_s25 }
  0x2f   : > { %s173_s30 = sadd.s32 %s2375_s24, %s172_s29  ;;  %p197_p3 = scmp.eq.s32.totalorder %s2383_s26, 0 }
  0x30   : > { %p52_p4 = scmp.ge.s32.totalorder %s2911_s28, 2  ;;  %s1860_s14 = sadd.s32 4294967293, %s173_s30 }
  0x31   : > { %p175_p5 = scmp.gt.s32.totalorder %s1860_s14, 0  ;;  %p1861_p6 = scmp.lt.s32.totalorder %s1860_s14, 1 }
  0x32   : > { %s2913_s28 = smov (%p52_p4, %s2911_s28), 0  ;;  %p2580_p7 = por %p197_p3, %p196_p2 }
  0x33   : > { %2889 = sst [smem:[#allocation14_spill]] %s2913_s28  ;;  %s179_s15 = smul.u32 3, %s2913_s28 }
  0x34   : > { %s2915_s14 = smov (!%p175_p5, %s1860_s14), 0  ;;  %s189_s18 = sadd.s32 1, %s2363_s22 }
  0x35   : > { %s180_s0 = sadd.s32 %s179_s15, %s2909_s27  ;;  %s2917_s14 = smov (!%p1861_p6, %s2915_s14), 1 }
  0x36   : > { %s1866_s1 = sadd.s32 4294967293, %s180_s0  ;;  %p1919_p11 = scmp.ge.s32.totalorder %s2383_s26, 6 }
  0x37   : > { %p182_p8 = scmp.gt.s32.totalorder %s1866_s1, 0  ;;  %p1867_p9 = scmp.lt.s32.totalorder %s1866_s1, 1 }
  0x39   : > { %s2919_s1 = smov (!%p182_p8, %s1866_s1), 0 }
  0x3a   : > { %s2921_s1 = smov (!%p1867_p9, %s2919_s1), 1 }
  0x3b   : > { %s186_s17 = ssub.s32 %s2917_s14, %s2921_s1 }
  0x3c   : > { %p187_p10 = scmp.eq.s32.totalorder %s186_s17, 0  ;;  %482 = sbr.rel (%p1919_p11) target bundleno = 153 (0x99), region = 16 }
  0x3e   : > { %s2590_s19 = scalar_select %p187_p10, %s2363_s22, %s189_s18  }
  0x40   : > { %2891 = sst [smem:[#allocation15_spill]] %s2590_s19 }
  0x41   : > { %546 = sbr.rel (!%p2580_p7) target bundleno = 109 (0x6d), region = 32  ;;  %s548_s20 = sand.u32 (%p2580_p7), 1, %s2363_s22  }
  0x42   : > { %s1927_s29 = sshll.u32 (%p2580_p7), %s2917_s14, 1  ;;  %s1920_s30 = sshll.u32 (%p2580_p7), %s548_s20, 5 }
  0x43   : > { %s559_s15 = ssub.s32 (%p2580_p7), 3, %s1927_s29  ;;  %s2031_s0 = sshll.u32 (%p2580_p7), %s2917_s14, 4 }
  0x44   : > { %p560_p12 = scmp.lt.s32.totalorder (%p2580_p7), %s559_s15, 2  ;;  %s2892_s6 = sld [smem:[#allocation16_spill]] (%p2580_p7) }
  0x45   : > { %s2606_s27 = scalar_lea.vmem (%p2580_p7), [#allocation6], %s1920_s30  }
  0x46   : > { %s2923_s15 = smov (!%p560_p12, %s559_s15), 2 }
  0x47   : > { %s1928_s28 = sshll.u32 %s2923_s15, 8 }
  0x48   : > { %p1931_p13 = scmp.eq.s32.totalorder %s1928_s28, 0 }
  0x49   : > { %s2609_s25 = sshrl.u32 (!%p1931_p13), %s2923_s15, 1 }
  0x4a   : > { %s2603_s18 = scalar_lea.vmem %s2892_s6, %s2031_s0   ;;  %568 = sbr.rel (%p1931_p13) target bundleno = 109 (0x6d), region = 36 }
  0x4b   : > { %p1932_p0 = scmp.le.s32.totalorder (!%p1931_p13), %s2609_s25, 0 }
  0x4f   : > { %1681 = sbr.rel (%p1932_p0) target bundleno = 92 (0x5c), region = 271  ;;  %s2893_s20 = smov (!%p1932_p0), %s2606_s27 }
  0x50   : > { %s2894_s29 = smov (!%p1932_p0), %s2603_s18  ;;  %s2618_s1 = smov (!%p1932_p0), 0  }
  0x51   : > { %s2397_s0 = smov (!%p1932_p0), 0  }
  0x54 LB: >> { %v639_v0 = vld [vmem:[%s2391_s29] sm:$0xff]  ;;  %v641_v1 = vld [vmem:[%s2391_s29 + $0x8] sm:$0xff]  ;;  %v643_v2 = vld [vmem:[%s2391_s29 + $0x18] sm:$0xff]  ;;  %s647_s28 = sadd.s32 1, %s2395_s1  ;;  %s633_s0 = sadd.s32 1, %s2399_s0   ;;  %s2399_s0 = sphi %s2397_s0, %s633_s0   ;;  %s2395_s1 = sphi %s2618_s1, %s2895_s1   ;;  %s2391_s29 = sphi %s2894_s29, %s652_s29   ;;  %s2387_s20 = sphi %s2893_s20, %s653_s20  }
  0x55   : >> { %640 = vst [vmem:[%s2387_s20] sm:$0xff] %v639_v0  ;;  %642 = vst [vmem:[%s2387_s20 + $0x8] sm:$0xff] %v641_v1  ;;  %v645_v3 = vld [vmem:[%s2391_s29 + $0x20] sm:$0xff]  ;;  %p648_p1 = scmp.ge.s32.totalorder %s647_s28, %s2609_s25  ;;  %p632_p2 = scmp.ge.s32.totalorder %s633_s0, %s2609_s25 }
  0x56   : >> { %644 = vst [vmem:[%s2387_s20 + $0x10] sm:$0xff] %v643_v2  ;;  %646 = vst [vmem:[%s2387_s20 + $0x18] sm:$0xff] %v645_v3 }
  0x57   : >> { %s2925_s28 = smov (%p648_p1, %s647_s28), 0  ;;  %635 = sbr.rel (!%p632_p2) target bundleno = 84 (0x54), region = 277 }
  0x58   : >> { %s1933_s30 = sshll.u32 %s2925_s28, 4  ;;  %s2895_s1 = smov %s2925_s28 }
  0x59   : >> { %s652_s29 = scalar_lea.vmem %s2603_s18, %s1933_s30   ;;  %s653_s20 = scalar_lea.vmem %s2606_s27, %s1933_s30 [#allocation6]  }
  0x5c PF: > { %s2634_s17 = sand.u32 1, %s2923_s15   ;;  %s2032_s1 = sshll.u32 %s2609_s25, 4 }
  0x5d   : > { %s2638_s30 = scalar_lea.vmem %s2603_s18, %s2032_s1   ;;  %s660_s6 = scalar_lea.vmem %s2606_s27, %s2032_s1 [#allocation6]  }
  0x5e   : > { %p1938_p3 = scmp.le.s32.totalorder %s2634_s17, 0 }
  0x5f   : > { %s2401_s24 = smov (!%p1938_p3), %s660_s6   ;;  %s2405_s19 = smov (!%p1938_p3), %s2638_s30  }
  0x60   : > { %1695 = sbr.rel (%p1938_p3) target bundleno = 109 (0x6d), region = 282  ;;  %s2409_s28 = smov (!%p1938_p3), 0  }
  0x61   : > { %s2413_s0 = smov (!%p1938_p3), 0  }
  0x65 LB: >> { %v670_v4 = vld [vmem:[%s2407_s19] sm:$0xff]  ;;  %v672_v5 = vld [vmem:[%s2407_s19 + $0x18] sm:$0xff]  ;;  %s674_s25 = sadd.s32 1, %s2411_s28  ;;  %s664_s0 = sadd.s32 1, %s2415_s0   ;;  %s2415_s0 = sphi %s2413_s0, %s664_s0   ;;  %s2411_s28 = sphi %s2409_s28, %s2410_s28   ;;  %s2407_s19 = sphi %s2405_s19, %s679_s19   ;;  %s2403_s24 = sphi %s2401_s24, %s680_s24  }
  0x66   : >> { %671 = vst [vmem:[%s2403_s24] sm:$0xff] %v670_v4  ;;  %673 = vst [vmem:[%s2403_s24 + $0x10] sm:$0xff] %v672_v5  ;;  %p675_p4 = scmp.ge.s32.totalorder %s674_s25, %s2634_s17  ;;  %p663_p5 = scmp.ge.s32.totalorder %s664_s0, %s2634_s17 }
  0x68   : >> { %s2927_s25 = smov (%p675_p4, %s674_s25), 0  ;;  %666 = sbr.rel (!%p663_p5) target bundleno = 101 (0x65), region = 288 }
  0x69   : >> { %s1939_s27 = sshll.u32 %s2927_s25, 3  ;;  %s2410_s28 = smov %s2927_s25  }
  0x6a   : >> { %s679_s19 = scalar_lea.vmem %s2638_s30, %s1939_s27   ;;  %s680_s24 = scalar_lea.vmem %s660_s6, %s1939_s27 [#allocation6]  }
  0x6d PF: > { %747 = sbr.rel (!%p2580_p7) target bundleno = 153 (0x99), region = 96  ;;  %s749_s15 = sand.u32 (%p2580_p7), 1, %s2363_s22  }
  0x6e   : > { %s1948_s18 = sshll.u32 (%p2580_p7), %s2917_s14, 1  ;;  %s1941_s20 = sshll.u32 (%p2580_p7), %s749_s15, 5 }
  0x6f   : > { %s760_s29 = ssub.s32 (%p2580_p7), 3, %s1948_s18  ;;  %s2036_s1 = sshll.u32 (%p2580_p7), %s2917_s14, 4 }
  0x70   : > { %p761_p6 = scmp.lt.s32.totalorder (%p2580_p7), %s760_s29, 2  ;;  %s2896_s10 = sld [smem:[#allocation18_spill]] (%p2580_p7) }
  0x71   : > { %s2659_s16 = scalar_lea.vmem (%p2580_p7), [#allocation7], %s1941_s20  }
  0x72   : > { %s2929_s29 = smov (!%p761_p6, %s760_s29), 2 }
  0x73   : > { %s1949_s17 = sshll.u32 %s2929_s29, 8 }
  0x74   : > { %p1952_p7 = scmp.eq.s32.totalorder %s1949_s17, 0 }
  0x75   : > { %s2662_s30 = sshrl.u32 (!%p1952_p7), %s2929_s29, 1 }
  0x76   : > { %s2656_s6 = scalar_lea.vmem %s2896_s10, %s2036_s1   ;;  %769 = sbr.rel (%p1952_p7) target bundleno = 153 (0x99), region = 100 }
  0x77   : > { %p1953_p8 = scmp.le.s32.totalorder (!%p1952_p7), %s2662_s30, 0 }
  0x7b   : > { %1709 = sbr.rel (%p1953_p8) target bundleno = 136 (0x88), region = 293  ;;  %s2897_s14 = smov (!%p1953_p8), %s2659_s16 }
  0x7c   : > { %s2898_s28 = smov (!%p1953_p8), %s2656_s6  ;;  %s2671_s0 = smov (!%p1953_p8), 0  }
  0x7d   : > { %s2429_s25 = smov (!%p1953_p8), 0  }
  0x80 LB: >> { %v840_v6 = vld [vmem:[%s2423_s28] sm:$0xff]  ;;  %v842_v7 = vld [vmem:[%s2423_s28 + $0x8] sm:$0xff]  ;;  %v844_v8 = vld [vmem:[%s2423_s28 + $0x18] sm:$0xff]  ;;  %s848_s27 = sadd.s32 1, %s2427_s0  ;;  %s834_s25 = sadd.s32 1, %s2431_s25   ;;  %s2431_s25 = sphi %s2429_s25, %s834_s25   ;;  %s2427_s0 = sphi %s2671_s0, %s2899_s0   ;;  %s2423_s28 = sphi %s2898_s28, %s853_s28   ;;  %s2419_s14 = sphi %s2897_s14, %s854_s14  }
  0x81   : >> { %841 = vst [vmem:[%s2419_s14] sm:$0xff] %v840_v6  ;;  %843 = vst [vmem:[%s2419_s14 + $0x8] sm:$0xff] %v842_v7  ;;  %v846_v9 = vld [vmem:[%s2423_s28 + $0x20] sm:$0xff]  ;;  %p849_p9 = scmp.ge.s32.totalorder %s848_s27, %s2662_s30  ;;  %p833_p10 = scmp.ge.s32.totalorder %s834_s25, %s2662_s30 }
  0x82   : >> { %845 = vst [vmem:[%s2419_s14 + $0x10] sm:$0xff] %v844_v8  ;;  %847 = vst [vmem:[%s2419_s14 + $0x18] sm:$0xff] %v846_v9 }
  0x83   : >> { %s2931_s27 = smov (%p849_p9, %s848_s27), 0  ;;  %836 = sbr.rel (!%p833_p10) target bundleno = 128 (0x80), region = 299 }
  0x84   : >> { %s1954_s15 = sshll.u32 %s2931_s27, 4  ;;  %s2899_s0 = smov %s2931_s27 }
  0x85   : >> { %s853_s28 = scalar_lea.vmem %s2656_s6, %s1954_s15   ;;  %s854_s14 = scalar_lea.vmem %s2659_s16, %s1954_s15 [#allocation7]  }
  0x88 PF: > { %s2687_s18 = sand.u32 1, %s2929_s29   ;;  %s2037_s20 = sshll.u32 %s2662_s30, 4 }
  0x89   : > { %s2691_s1 = scalar_lea.vmem %s2656_s6, %s2037_s20   ;;  %s861_s24 = scalar_lea.vmem %s2659_s16, %s2037_s20 [#allocation7]  }
  0x8a   : > { %p1959_p11 = scmp.le.s32.totalorder %s2687_s18, 0 }
  0x8b   : > { %s2433_s19 = smov (!%p1959_p11), %s861_s24   ;;  %s2437_s17 = smov (!%p1959_p11), %s2691_s1  }
  0x8c   : > { %1723 = sbr.rel (%p1959_p11) target bundleno = 153 (0x99), region = 304  ;;  %s2441_s0 = smov (!%p1959_p11), 0  }
  0x8d   : > { %s2445_s25 = smov (!%p1959_p11), 0  }
  0x91 LB: >> { %v871_v10 = vld [vmem:[%s2439_s17] sm:$0xff]  ;;  %v873_v11 = vld [vmem:[%s2439_s17 + $0x18] sm:$0xff]  ;;  %s875_s29 = sadd.s32 1, %s2443_s0  ;;  %s865_s25 = sadd.s32 1, %s2447_s25   ;;  %s2447_s25 = sphi %s2445_s25, %s865_s25   ;;  %s2443_s0 = sphi %s2441_s0, %s2442_s0   ;;  %s2439_s17 = sphi %s2437_s17, %s880_s17   ;;  %s2435_s19 = sphi %s2433_s19, %s881_s19  }
  0x92   : >> { %872 = vst [vmem:[%s2435_s19] sm:$0xff] %v871_v10  ;;  %874 = vst [vmem:[%s2435_s19 + $0x10] sm:$0xff] %v873_v11  ;;  %p876_p12 = scmp.ge.s32.totalorder %s875_s29, %s2687_s18  ;;  %p864_p13 = scmp.ge.s32.totalorder %s865_s25, %s2687_s18 }
  0x94   : >> { %s2933_s29 = smov (%p876_p12, %s875_s29), 0  ;;  %867 = sbr.rel (!%p864_p13) target bundleno = 145 (0x91), region = 310 }
  0x95   : >> { %s1960_s6 = sshll.u32 %s2933_s29, 3  ;;  %s2442_s0 = smov %s2933_s29  }
  0x96   : >> { %s880_s17 = scalar_lea.vmem %s2691_s1, %s1960_s6   ;;  %s881_s19 = scalar_lea.vmem %s861_s24, %s1960_s6 [#allocation7]  }
  0x99 PF: > { %p1962_p0 = scmp.ge.s32.totalorder %s2383_s26, 1  ;;  %p886_p1 = scmp.lt.s32.totalorder %s2383_s26, 7 }
  0x9b   : > { %p887_p2 = pnand %p1962_p0, %p886_p1 }
  0x9c   : > { %s893_s16 = sand.u32 (!%p887_p2), 1, %s2359_s21   ;;  %s1164_s30 = smul.u32 (!%p887_p2), 3, %s2371_s2 }
  0x9d   : > { %890 = sbr.rel (%p887_p2) target bundleno = 270 (0x10e), region = 148  ;;  %s2703_s14 = sshll.u32 (!%p887_p2), %s893_s16, 5 }
  0x9e   : > { %p1167_p3 = scmp.lt.s32.totalorder (!%p887_p2), %s2371_s2, 1  ;;  %s1165_s28 = sadd.s32 (!%p887_p2), %s2367_s23, %s1164_s30 }
  0x9f   : > { %s1166_s27 = sld [smem:[#allocation3 + %s1165_s28]] (!%p887_p2)  ;;  %s2731_s23 = scalar_lea.vmem (!%p887_p2), [#allocation7], %s2703_s14 }
  0xa0   : > { %s1181_s15 = sld [smem:[#allocation3 + %s1165_s28]] (!%p887_p2) }
  0xa1   : > { %s1196_s18 = sld [smem:[#allocation3 + %s1165_s28]] (!%p887_p2) }
  0xa2   : > { %s2935_s2 = smov (!%p1167_p3, %s2371_s2), 1  ;;  %s2708_s20 = sld [smem:[#allocation3 + %s1165_s28]] }
  0xa3   : > { %s2710_s1 = sld [smem:[#allocation5 + %s1165_s28]]  ;;  %s2006_s19 = sshll.u32 %s2935_s2, 3 }
  0xa4   : > { %s1213_s24 = sld [smem:[#allocation4 + %s1165_s28]] }
  0xa5   : > { %p1169_p4 = scmp.lt.s32.totalorder %s1166_s27, 3 }
  0xa6   : > { %p1184_p5 = scmp.lt.s32.totalorder %s1181_s15, 3 }
  0xa7   : > { %s2937_s27 = smov (!%p1169_p4, %s1166_s27), 3  ;;  %p1199_p6 = scmp.lt.s32.totalorder %s1196_s18, 3 }
  0xa8   : > { %s2005_s17 = sshll.u32 %s2937_s27, 1  ;;  %s2939_s15 = smov (!%p1184_p5, %s1181_s15), 3 }
  0xa9   : > { %s1173_s21 = sadd.s32 %s2006_s19, %s2005_s17  ;;  %s2941_s18 = smov (!%p1199_p6, %s1196_s18), 3 }
  0xaa   : > { %s2007_s0 = sshll.u32 %s1173_s21, 3  ;;  %s2008_s6 = sshll.u32 %s2939_s15, 1 }
  0xab   : > { %s2715_s29 = scalar_lea.vmem %s2869_s11, %s2007_s0  ;;  %s1188_s16 = sadd.s32 %s2008_s6, %s2006_s19 }
  0xac   : > { %s2011_s30 = sshll.u32 %s2941_s18, 1  ;;  %s2010_s28 = sshll.u32 %s1188_s16, 3 }
  0xad   : > { %s1203_s2 = sadd.s32 %s2011_s30, %s2006_s19  ;;  %s2720_s22 = scalar_lea.vmem %s2870_s12, %s2010_s28 }
  0xae   : > { %s2013_s17 = sshll.u32 %s1203_s2, 3  ;;  %s2728_s0 = scalar_lea.vmem [#allocation6], %s2703_s14 }
  0xaf   : > { %s2725_s9 = scalar_lea.vmem %s2871_s13, %s2013_s17  ;;  %p2014_p7 = scmp.ne.s32.totalorder %s1213_s24, 1 }
  0xb1   : > { %1217 = sbr.rel (%p2014_p7) target bundleno = 186 (0xba), region = 160 }
  0xb6   : > { %v2452_v12 = vmov 0.0  }
  0xb7   : > { %1218 = vst [vmem:[%s2715_s29] sm:$0xff] %v2452_v12  ;;  %1219 = vst [vmem:[%s2715_s29 + $0x8] sm:$0xff] %v2452_v12 }
  0xb8   : > { %1220 = vst [vmem:[%s2720_s22] sm:$0xff] %v2452_v12  ;;  %1221 = vst [vmem:[%s2720_s22 + $0x8] sm:$0xff] %v2452_v12 }
  0xb9   : > { %1222 = vst [vmem:[%s2725_s9] sm:$0xff] %v2452_v12  ;;  %1223 = vst [vmem:[%s2725_s9 + $0x8] sm:$0xff] %v2452_v12 }
  0xba PF: > { %p2015_p8 = scmp.ne.s32.totalorder %s2708_s20, 0 }
  0xbc   : > { %1227 = sbr.rel (%p2015_p8) target bundleno = 206 (0xce), region = 164 }
  0xc1   : > { %v1232_v13 = vlaneseq  ;;  %v1228_v14 = vld [vmem:[%s2861_s3] sm:$0xff]  ;;  %v1234_v15 = vstv %s2710_s1  ;;  %v1229_v18 = vld [vmem:[%s2861_s3 + $0x8] sm:$0xff] }
  0xc2   : > { %v1230_v16 = vld [vmem:[%s2865_s7] sm:$0xff]  ;;  %v1231_v19 = vld [vmem:[%s2865_s7 + $0x8] sm:$0xff] }
  0xc3   : > { %v1233_v17 = vshrl.u32 %v1232_v13, 7  ;;  %v1246_v20 = vld [vmem:[%s2715_s29] sm:$0xff]  ;;  %v1247_v21 = vld [vmem:[%s2715_s29 + $0x8] sm:$0xff] }
  0xc4   : > { %v1254_v26 = vld [vmem:[%s2720_s22] sm:$0xff]  ;;  %v1255_v27 = vld [vmem:[%s2720_s22 + $0x8] sm:$0xff] }
  0xc5   : > { %vm1235_vm0 = vcmp.lt.s32.totalorder %v1233_v17, %v1234_v15  ;;  %v1262_v32 = vld [vmem:[%s2725_s9] sm:$0xff]  ;;  %v1263_v33 = vld [vmem:[%s2725_s9 + $0x8] sm:$0xff] }
  0xc6   : > { %v1236_v22 = vsel %vm1235_vm0, %v1228_v14, 0.0  ;;  %v1238_v23 = vsel %vm1235_vm0, %v1230_v16, 0.0  ;;  %v1237_v24 = vsel %vm1235_vm0, %v1229_v18, 0.0  ;;  %v1239_v25 = vsel %vm1235_vm0, %v1231_v19, 0.0 }
  0xc7   : > { %v1240_v28 = vmul.f32 %v1238_v23, %v1236_v22  ;;  %v1241_v29 = vmul.f32 %v1239_v25, %v1237_v24  ;;  %v1242_v30 = vmul.f32 %v1236_v22, %v1236_v22  ;;  %v1243_v31 = vmul.f32 %v1237_v24, %v1237_v24 }
  0xc8   : > { %v1244_v34 = vmul.f32 %v1238_v23, %v1238_v23  ;;  %v1245_v35 = vmul.f32 %v1239_v25, %v1239_v25 }
  0xc9   : > { %v1250_v36 = vadd.f32 %v1246_v20, %v1240_v28  ;;  %v1251_v37 = vadd.f32 %v1247_v21, %v1241_v29  ;;  %v1258_v38 = vadd.f32 %v1254_v26, %v1242_v30  ;;  %v1259_v39 = vadd.f32 %v1255_v27, %v1243_v31 }
  0xca   : > { %v1266_v40 = vadd.f32 %v1262_v32, %v1244_v34  ;;  %v1267_v41 = vadd.f32 %v1263_v33, %v1245_v35 }
  0xcb   : > { %1252 = vst [vmem:[%s2715_s29] sm:$0xff] %v1250_v36  ;;  %1253 = vst [vmem:[%s2715_s29 + $0x8] sm:$0xff] %v1251_v37 }
  0xcc   : > { %1260 = vst [vmem:[%s2720_s22] sm:$0xff] %v1258_v38  ;;  %1261 = vst [vmem:[%s2720_s22 + $0x8] sm:$0xff] %v1259_v39 }
  0xcd   : > { %1268 = vst [vmem:[%s2725_s9] sm:$0xff] %v1266_v40  ;;  %1269 = vst [vmem:[%s2725_s9 + $0x8] sm:$0xff] %v1267_v41 }
  0xce PF: > { %p2016_p9 = scmp.ne.s32.totalorder %s2708_s20, 1 }
  0xd0   : > { %1273 = sbr.rel (%p2016_p9) target bundleno = 226 (0xe2), region = 168 }
  0xd5   : > { %v1278_v42 = vlaneseq  ;;  %v1274_v43 = vld [vmem:[%s2862_s4] sm:$0xf]  ;;  %v1280_v45 = vstv %s2710_s1  ;;  %v1275_v47 = vld [vmem:[%s2862_s4 + $0x4] sm:$0xf]  ;;  %v1293_v50 = vld [vmem:[%s2715_s29 + $0x8] sm:$0xf] }
  0xd6   : > { %v1276_v44 = vld [vmem:[%s2866_s8] sm:$0xf]  ;;  %v1277_v48 = vld [vmem:[%s2866_s8 + $0x4] sm:$0xf]  ;;  %v1299_v56 = vld [vmem:[%s2720_s22 + $0x8] sm:$0xf] }
  0xd7   : > { %v1279_v46 = vshrl.u32 %v1278_v42, 7  ;;  %v1292_v49 = vld [vmem:[%s2715_s29] sm:$0xf]  ;;  %v1305_v62 = vld [vmem:[%s2725_s9 + $0x8] sm:$0xf] }
  0xd8   : > { %v1298_v51 = vld [vmem:[%s2720_s22] sm:$0xf] }
  0xd9   : > { %vm1281_vm1 = vcmp.lt.s32.totalorder %v1279_v46, %v1280_v45  ;;  %v1304_v61 = vld [vmem:[%s2725_s9] sm:$0xf] }
  0xda   : > { %v1282_v52 = vsel %vm1281_vm1, %v1274_v43, 0.0  ;;  %v1284_v53 = vsel %vm1281_vm1, %v1276_v44, 0.0  ;;  %v1283_v54 = vsel %vm1281_vm1, %v1275_v47, 0.0  ;;  %v1285_v55 = vsel %vm1281_vm1, %v1277_v48, 0.0 }
  0xdb   : > { %v1286_v57 = vmul.f32 %v1284_v53, %v1282_v52  ;;  %v1287_v58 = vmul.f32 %v1285_v55, %v1283_v54  ;;  %v1288_v59 = vmul.f32 %v1282_v52, %v1282_v52  ;;  %v1289_v60 = vmul.f32 %v1283_v54, %v1283_v54 }
  0xdc   : > { %v1290_v63 = vmul.f32 %v1284_v53, %v1284_v53  ;;  %v1291_v0 = vmul.f32 %v1285_v55, %v1285_v55 }
  0xdd   : > { %v1294_v1 = vadd.f32 %v1292_v49, %v1286_v57  ;;  %v1295_v2 = vadd.f32 %v1293_v50, %v1287_v58  ;;  %v1300_v3 = vadd.f32 %v1298_v51, %v1288_v59  ;;  %v1301_v4 = vadd.f32 %v1299_v56, %v1289_v60 }
  0xde   : > { %v1306_v5 = vadd.f32 %v1304_v61, %v1290_v63  ;;  %v1307_v6 = vadd.f32 %v1305_v62, %v1291_v0 }
  0xdf   : > { %1296 = vst [vmem:[%s2715_s29] sm:$0xf] %v1294_v1  ;;  %1297 = vst [vmem:[%s2715_s29 + $0x8] sm:$0xf] %v1295_v2 }
  0xe0   : > { %1302 = vst [vmem:[%s2720_s22] sm:$0xf] %v1300_v3  ;;  %1303 = vst [vmem:[%s2720_s22 + $0x8] sm:$0xf] %v1301_v4 }
  0xe1   : > { %1308 = vst [vmem:[%s2725_s9] sm:$0xf] %v1306_v5  ;;  %1309 = vst [vmem:[%s2725_s9 + $0x8] sm:$0xf] %v1307_v6 }
  0xe2 PF: > { %p2017_p10 = scmp.ne.s32.totalorder %s2708_s20, 2 }
  0xe3   : > { %s2900_s18 = sld [smem:[#allocation17_spill]] (!%p2017_p10) }
  0xe4   : > { %1313 = sbr.rel (%p2017_p10) target bundleno = 246 (0xf6), region = 172 }
  0xe9   : > { %v1318_v7 = vlaneseq  ;;  %v1314_v8 = vld [vmem:[%s2863_s5] sm:$0x7]  ;;  %v1320_v10 = vstv %s2710_s1  ;;  %v1315_v12 = vld [vmem:[%s2863_s5 + $0x4] sm:$0x7]  ;;  %v1333_v15 = vld [vmem:[%s2715_s29 + $0x8] sm:$0x7] }
  0xea   : > { %v1316_v9 = vld [vmem:[%s2900_s18] sm:$0x7]  ;;  %v1317_v13 = vld [vmem:[%s2900_s18 + $0x4] sm:$0x7]  ;;  %v1339_v21 = vld [vmem:[%s2720_s22 + $0x8] sm:$0x7] }
  0xeb   : > { %v1319_v11 = vshrl.u32 %v1318_v7, 7  ;;  %v1332_v14 = vld [vmem:[%s2715_s29] sm:$0x7]  ;;  %v1345_v27 = vld [vmem:[%s2725_s9 + $0x8] sm:$0x7] }
  0xec   : > { %v1338_v16 = vld [vmem:[%s2720_s22] sm:$0x7] }
  0xed   : > { %vm1321_vm2 = vcmp.lt.s32.totalorder %v1319_v11, %v1320_v10  ;;  %v1344_v26 = vld [vmem:[%s2725_s9] sm:$0x7] }
  0xee   : > { %v1322_v17 = vsel %vm1321_vm2, %v1314_v8, 0.0  ;;  %v1324_v18 = vsel %vm1321_vm2, %v1316_v9, 0.0  ;;  %v1323_v19 = vsel %vm1321_vm2, %v1315_v12, 0.0  ;;  %v1325_v20 = vsel %vm1321_vm2, %v1317_v13, 0.0 }
  0xef   : > { %v1326_v22 = vmul.f32 %v1324_v18, %v1322_v17  ;;  %v1327_v23 = vmul.f32 %v1325_v20, %v1323_v19  ;;  %v1328_v24 = vmul.f32 %v1322_v17, %v1322_v17  ;;  %v1329_v25 = vmul.f32 %v1323_v19, %v1323_v19 }
  0xf0   : > { %v1330_v28 = vmul.f32 %v1324_v18, %v1324_v18  ;;  %v1331_v29 = vmul.f32 %v1325_v20, %v1325_v20 }
  0xf1   : > { %v1334_v30 = vadd.f32 %v1332_v14, %v1326_v22  ;;  %v1335_v31 = vadd.f32 %v1333_v15, %v1327_v23  ;;  %v1340_v32 = vadd.f32 %v1338_v16, %v1328_v24  ;;  %v1341_v33 = vadd.f32 %v1339_v21, %v1329_v25 }
  0xf2   : > { %v1346_v34 = vadd.f32 %v1344_v26, %v1330_v28  ;;  %v1347_v35 = vadd.f32 %v1345_v27, %v1331_v29 }
  0xf3   : > { %1336 = vst [vmem:[%s2715_s29] sm:$0x7] %v1334_v30  ;;  %1337 = vst [vmem:[%s2715_s29 + $0x8] sm:$0x7] %v1335_v31 }
  0xf4   : > { %1342 = vst [vmem:[%s2720_s22] sm:$0x7] %v1340_v32  ;;  %1343 = vst [vmem:[%s2720_s22 + $0x8] sm:$0x7] %v1341_v33 }
  0xf5   : > { %1348 = vst [vmem:[%s2725_s9] sm:$0x7] %v1346_v34  ;;  %1349 = vst [vmem:[%s2725_s9 + $0x8] sm:$0x7] %v1347_v35 }
  0xf6 PF: > { %p2018_p11 = scmp.ne.s32.totalorder %s2708_s20, 3 }
  0xf8   : > { %1353 = sbr.rel (%p2018_p11) target bundleno = 270 (0x10e), region = 176 }
  0xfd   : > { %v1362_v36 = vlaneseq  ;;  %v1354_v37 = vld [vmem:[%s2728_s0] sm:$0xff]  ;;  %v1365_v38 = vstv %s2710_s1  ;;  %v1356_v41 = vld [vmem:[%s2728_s0 + $0x10] sm:$0xff]  ;;  %v1355_v43 = vld [vmem:[%s2728_s0 + $0x8] sm:$0xff] }
  0xfe   : > { %v1358_v39 = vld [vmem:[%s2731_s23] sm:$0xff]  ;;  %v1360_v42 = vld [vmem:[%s2731_s23 + $0x10] sm:$0xff]  ;;  %v1359_v44 = vld [vmem:[%s2731_s23 + $0x8] sm:$0xff] }
  0xff   : > { %v1363_v40 = vshrl.u32 %v1362_v36, 7  ;;  %v1357_v46 = vld [vmem:[%s2728_s0 + $0x18] sm:$0xff]  ;;  %v1388_v63 = vld [vmem:[%s2715_s29] sm:$0xff]  ;;  %v1389_v0 = vld [vmem:[%s2715_s29 + $0x8] sm:$0xff] }
 0x100   : > { %v1361_v47 = vld [vmem:[%s2731_s23 + $0x18] sm:$0xff]  ;;  %v1396_v1 = vld [vmem:[%s2720_s22] sm:$0xff]  ;;  %v1397_v9 = vld [vmem:[%s2720_s22 + $0x8] sm:$0xff] }
 0x101   : > { %v1364_v45 = vadd.s32 8, %v1363_v40  ;;  %vm1366_vm3 = vcmp.lt.s32.totalorder %v1363_v40, %v1365_v38  ;;  %v1404_v10 = vld [vmem:[%s2725_s9] sm:$0xff]  ;;  %v1405_v14 = vld [vmem:[%s2725_s9 + $0x8] sm:$0xff] }
 0x102   : > { %v1368_v48 = vsel %vm1366_vm3, %v1354_v37, 0.0  ;;  %v1372_v49 = vsel %vm1366_vm3, %v1358_v39, 0.0  ;;  %v1370_v50 = vsel %vm1366_vm3, %v1356_v41, 0.0  ;;  %v1374_v51 = vsel %vm1366_vm3, %v1360_v42, 0.0 }
 0x103   : > { %vm1367_vm4 = vcmp.lt.s32.totalorder %v1364_v45, %v1365_v38  ;;  %v1376_v52 = vmul.f32 %v1372_v49, %v1368_v48  ;;  %v1378_v53 = vmul.f32 %v1374_v51, %v1370_v50  ;;  %v1380_v54 = vmul.f32 %v1368_v48, %v1368_v48 }
 0x104   : > { %v1369_v55 = vsel %vm1367_vm4, %v1355_v43, 0.0  ;;  %v1373_v56 = vsel %vm1367_vm4, %v1359_v44, 0.0  ;;  %v1371_v57 = vsel %vm1367_vm4, %v1357_v46, 0.0  ;;  %v1375_v58 = vsel %vm1367_vm4, %v1361_v47, 0.0 }
 0x105   : > { %v1377_v59 = vmul.f32 %v1373_v56, %v1369_v55  ;;  %v1379_v60 = vmul.f32 %v1375_v58, %v1371_v57  ;;  %v1381_v61 = vmul.f32 %v1369_v55, %v1369_v55  ;;  %v1382_v62 = vmul.f32 %v1370_v50, %v1370_v50 }
 0x106   : > { %v1383_v2 = vmul.f32 %v1371_v57, %v1371_v57  ;;  %v1384_v3 = vmul.f32 %v1372_v49, %v1372_v49  ;;  %v1385_v4 = vmul.f32 %v1373_v56, %v1373_v56  ;;  %v1386_v5 = vmul.f32 %v1374_v51, %v1374_v51 }
 0x107   : > { %v1390_v6 = vadd.f32 %v1377_v59, %v1376_v52  ;;  %v1391_v7 = vadd.f32 %v1379_v60, %v1378_v53  ;;  %v1398_v8 = vadd.f32 %v1381_v61, %v1380_v54  ;;  %v1387_v11 = vmul.f32 %v1375_v58, %v1375_v58 }
 0x108   : > { %v1399_v12 = vadd.f32 %v1383_v2, %v1382_v62  ;;  %v1406_v13 = vadd.f32 %v1385_v4, %v1384_v3 }
 0x109   : > { %v1392_v15 = vadd.f32 %v1390_v6, %v1388_v63  ;;  %v1393_v16 = vadd.f32 %v1391_v7, %v1389_v0  ;;  %v1400_v17 = vadd.f32 %v1398_v8, %v1396_v1  ;;  %v1407_v18 = vadd.f32 %v1387_v11, %v1386_v5 }
 0x10a   : > { %v1401_v19 = vadd.f32 %v1399_v12, %v1397_v9  ;;  %v1408_v20 = vadd.f32 %v1406_v13, %v1404_v10 }
 0x10b   : > { %1394 = vst [vmem:[%s2715_s29] sm:$0xff] %v1392_v15  ;;  %1395 = vst [vmem:[%s2715_s29 + $0x8] sm:$0xff] %v1393_v16  ;;  %v1409_v21 = vadd.f32 %v1407_v18, %v1405_v14 }
 0x10c   : > { %1402 = vst [vmem:[%s2720_s22] sm:$0xff] %v1400_v17  ;;  %1403 = vst [vmem:[%s2720_s22 + $0x8] sm:$0xff] %v1401_v19 }
 0x10d   : > { %1410 = vst [vmem:[%s2725_s9] sm:$0xff] %v1408_v20  ;;  %1411 = vst [vmem:[%s2725_s9 + $0x8] sm:$0xff] %v1409_v21 }
 0x10e PF: > { %s2901_s20 = sld [smem:[#allocation12_spill]] }
 0x10f   : > { %s2902_s21 = sld [smem:[#allocation9_spill]] }
 0x110   : > { %s2903_s22 = sld [smem:[#allocation15_spill]] }
 0x111   : > { %s2904_s23 = sld [smem:[#allocation10_spill]] }
 0x112   : > { %s2905_s2 = sld [smem:[#allocation11_spill]] }
 0x113   : > { %s2906_s24 = sld [smem:[#allocation13_spill]] }
 0x114   : > { %s38_s26 = sadd.s32 1, %s2901_s20   ;;  %s2907_s25 = sld [smem:[#allocation14_spill]] }
 0x115   : > { %p35_p12 = scmp.ge.s32.totalorder %s38_s26, 8  }
 0x117   :  { %37 = sbr.rel (!%p35_p12) target bundleno = 41 (0x29), region = 321 }

</bundles_post_ra>
